<compile_context>
chip_gen: v5e
topology: v5e:2x2
jax: 0.10.0
libtpu: 0.0.40
codegen_flags: <defaults>
</compile_context>

<pallas_src>
import math
import jax
import jax.numpy as jnp
from jax import lax
from jax.experimental import pallas as pl
from jax.experimental.pallas import tpu as pltpu

# ---- small config consistent with the module's __init__ ----
VOCAB = 32      # vocab_size
D = 32          # embedding_dim
S = 8           # sequence_length
LAYERS = 2      # transformer_layers
HEADS = 2       # attention_heads
FF = 64         # feed_forward
PAD = 0         # padding_index
B = 2           # batch
HD = D // HEADS
N = B * S       # batch folded into the row axis
EPS = 1e-5

# ---- row layout of the packed (rows, 1, D) vector buffer ----
_PER = HEADS + 9                     # rows per layer (c_h per head + 9 vectors)
_SA = HEADS + 0                      # self-attn folded bias: b_v @ Wo^T + b_o
_CA = HEADS + 1                      # cross-attn constant (memory == 0 fold)
_B2 = HEADS + 2                      # FF second bias
_L1G, _L1B = HEADS + 3, HEADS + 4    # norm1 gamma/beta
_L2G, _L2B = HEADS + 5, HEADS + 6    # norm2 gamma/beta
_L3G, _L3B = HEADS + 7, HEADS + 8    # norm3 gamma/beta
_FING = LAYERS * _PER                # final LN gamma
_FINB = LAYERS * _PER + 1            # final LN beta
NVD = LAYERS * _PER + 2


def _vrow(layer, off):
    return layer * _PER + off


# ---------------- in-kernel helpers ----------------
def _layer_norm(x, g, b):
    # PyTorch LayerNorm over last dim, biased variance, eps=1e-5.
    mean = jnp.mean(x, axis=-1, keepdims=True)
    var = jnp.mean((x - mean) ** 2, axis=-1, keepdims=True)
    return (x - mean) * lax.rsqrt(var + EPS) * g + b


def _gelu(x):
    # exact (erf) gelu, matching torch.nn.functional.gelu default
    return 0.5 * x * (1.0 + lax.erf(x * (1.0 / math.sqrt(2.0))))


# ---------------- fused Pallas kernel (single invocation, no grid) ----------
def fused_gpt_kernel(tok_ref, emb_ref, pe_ref, mats_ref, w1_ref, w2_ref,
                     vd_ref, vf_ref, wout_ref, o_ref):
    # ---- embedding lookup as a one-hot matmul + positional encoding add ----
    # TODO(synk): out-of-range token ids map to the zero vector instead of
    # raising like nn.Embedding would.
    tok = tok_ref[...]                                         # (N, 1) int32
    col = lax.broadcasted_iota(jnp.int32, (N, VOCAB), 1)       # (N, VOCAB)
    onehot = (tok == col).astype(jnp.float32)
    x = jnp.dot(onehot, emb_ref[...], preferred_element_type=jnp.float32)
    x = x + pe_ref[...]                                        # (N, D)
    # self.dropout: identity (eval / integer dropout config)

    # ---- block-diagonal attention mask (batch rows folded into axis 0) ----
    ri = lax.broadcasted_iota(jnp.int32, (N, N), 0)
    ci = lax.broadcasted_iota(jnp.int32, (N, N), 1)
    if (S & (S - 1)) == 0:                                     # static branch
        shift = S.bit_length() - 1
        rb = jnp.right_shift(ri, shift)
        cb = jnp.right_shift(ci, shift)
    else:
        rb = ri // S
        cb = ci // S
    amask = jnp.where(rb == cb, 0.0, -1e30).astype(jnp.float32)  # (N, N)

    for l in range(LAYERS):                                    # static unroll
        # ---- self-attention (algebraically folded per head) + norm1 ----
        acc = None
        for h in range(HEADS):                                 # static unroll
            A = mats_ref[(l * HEADS + h) * 2]                  # (D, D)
            M = mats_ref[(l * HEADS + h) * 2 + 1]              # (D, D)
            c = vd_ref[_vrow(l, h)]                            # (1, D)
            qa = jnp.dot(x, A, preferred_element_type=jnp.float32) + c
            # scores without any activation transpose: contract dim 1 of both
            s = lax.dot_general(qa, x, (((1,), (1,)), ((), ())),
                                preferred_element_type=jnp.float32)  # (N, N)
            s = s + amask
            s = s - jnp.max(s, axis=-1, keepdims=True)
            e = jnp.exp(s)
            p = e / jnp.sum(e, axis=-1, keepdims=True)
            xv = jnp.dot(x, M, preferred_element_type=jnp.float32)   # (N, D)
            contrib = jnp.dot(p, xv, preferred_element_type=jnp.float32)
            acc = contrib if acc is None else acc + contrib
        sa = acc + vd_ref[_vrow(l, _SA)]                       # (N, D)
        x = _layer_norm(x + sa, vd_ref[_vrow(l, _L1G)], vd_ref[_vrow(l, _L1B)])

        # ---- cross-attention block: memory == zeros -> exact constant ----
        x = _layer_norm(x + vd_ref[_vrow(l, _CA)],
                        vd_ref[_vrow(l, _L2G)], vd_ref[_vrow(l, _L2B)])

        # ---- feed-forward block + norm3 ----
        hdn = _gelu(jnp.dot(x, w1_ref[l], preferred_element_type=jnp.float32)
                    + vf_ref[l])
        ff = jnp.dot(hdn, w2_ref[l], preferred_element_type=jnp.float32) \
             + vd_ref[_vrow(l, _B2)]
        x = _layer_norm(x + ff, vd_ref[_vrow(l, _L3G)], vd_ref[_vrow(l, _L3B)])

    # ---- final LayerNorm + Linear(D, vocab, bias=False), single store ----
    x = _layer_norm(x, vd_ref[_FING], vd_ref[_FINB])
    o_ref[...] = jnp.dot(x, wout_ref[...], preferred_element_type=jnp.float32)


# ---------------- wrapper (single pallas_call, whole arrays in VMEM) --------
def gpt_forward(tokens, params):
    tok = tokens.astype(jnp.int32).reshape(N, 1)
    args = (tok, params["emb"], params["pe"], params["mats"],
            params["w1"], params["w2"], params["vd"], params["vf"],
            params["w_out"])
    vmem = pl.BlockSpec(memory_space=pltpu.MemorySpace.VMEM)
    logits = pl.pallas_call(
        fused_gpt_kernel,
        out_shape=jax.ShapeDtypeStruct((N, VOCAB), jnp.float32),
        in_specs=[vmem] * len(args),
        out_specs=vmem,
    )(*args)
    return logits                      # already (B*S, vocab) == view(-1, vocab)


# ---------------- parameter construction (deterministic, pre-folded) --------
def make_params(key):
    def nrm(k, shape, scale=0.05):
        return (scale * jax.random.normal(k, shape)).astype(jnp.float32)

    keys = iter(jax.random.split(key, 64))
    params = {}

    emb = nrm(next(keys), (VOCAB, D), 1.0)
    emb = emb.at[PAD].set(0.0)          # nn.Embedding padding_idx row is zero
    params["emb"] = emb

    # sinusoidal positional encoding table, tiled across the folded batch axis
    pos = jnp.arange(S, dtype=jnp.float32)[:, None]
    div = jnp.exp(jnp.arange(0, D, 2, dtype=jnp.float32) * (-math.log(10000.0) / D))
    pe = jnp.zeros((S, D), jnp.float32)
    pe = pe.at[:, 0::2].set(jnp.sin(pos * div))
    pe = pe.at[:, 1::2].set(jnp.cos(pos * div))
    params["pe"] = jnp.tile(pe, (B, 1))                      # (B*S, D)

    scale = 1.0 / math.sqrt(HD)
    mats, vd, w1s, w2s, vf = [], [], [], [], []
    for _ in range(LAYERS):
        # self-attention weights (PyTorch layout), then exact algebraic fold
        in_w = nrm(next(keys), (3 * D, D))                   # in_proj_weight
        in_b = nrm(next(keys), (3 * D,))                     # in_proj_bias
        out_w = nrm(next(keys), (D, D))                      # out_proj.weight
        out_b = nrm(next(keys), (D,))                        # out_proj.bias
        Wq, Wk, Wv = in_w[0:D], in_w[D:2 * D], in_w[2 * D:3 * D]
        bq, bv = in_b[0:D], in_b[2 * D:3 * D]

        head_c = []
        for h in range(HEADS):
            sl = slice(h * HD, (h + 1) * HD)
            Wq_h, Wk_h, Wv_h, bq_h = Wq[sl], Wk[sl], Wv[sl], bq[sl]
            A_h = scale * (Wq_h.T @ Wk_h)                    # (D, D)
            M_h = Wv_h.T @ out_w[:, sl].T                    # (D, D)
            c_h = scale * (bq_h @ Wk_h)                      # (D,)
            mats.append(A_h)
            mats.append(M_h)
            head_c.append(c_h.reshape(1, D))
        sa_const = (bv @ out_w.T + out_b).reshape(1, D)      # b_v Wo^T + b_o

        # cross-attention weights exist in the module; with memory == 0 the
        # block output is the constant b_v @ Wo^T + b_o (exact fold, eval mode)
        ca_in_b = nrm(next(keys), (3 * D,))
        ca_out_w = nrm(next(keys), (D, D))
        ca_out_b = nrm(next(keys), (D,))
        ca_const = (ca_in_b[2 * D:3 * D] @ ca_out_w.T + ca_out_b).reshape(1, D)

        lw1 = nrm(next(keys), (FF, D))
        lb1 = nrm(next(keys), (FF,))
        lw2 = nrm(next(keys), (D, FF))
        lb2 = nrm(next(keys), (D,))
        w1s.append(lw1.T)                                    # (D, FF)
        w2s.append(lw2.T)                                    # (FF, D)
        vf.append(lb1.reshape(1, FF))

        # packed per-layer vector rows (order must match the kernel offsets)
        vd.extend(head_c)                                    # offsets 0..H-1
        vd.append(sa_const)                                  # _SA
        vd.append(ca_const)                                  # _CA
        vd.append(lb2.reshape(1, D))                         # _B2
        one, zero = jnp.ones((1, D), jnp.float32), jnp.zeros((1, D), jnp.float32)
        vd.extend([one, zero, one, zero, one, zero])         # norms 1/2/3 g,b

    vd.append(jnp.ones((1, D), jnp.float32))                 # final LN gamma
    vd.append(jnp.zeros((1, D), jnp.float32))                # final LN beta
    assert len(vd) == NVD

    params["mats"] = jnp.stack(mats)          # (L*H*2, D, D)
    params["w1"] = jnp.stack(w1s)             # (L, D, FF)
    params["w2"] = jnp.stack(w2s)             # (L, FF, D)
    params["vf"] = jnp.stack(vf)              # (L, 1, FF)
    params["vd"] = jnp.stack(vd)              # (NVD, 1, D)
    params["w_out"] = nrm(next(keys), (VOCAB, D)).T          # stored (D, VOCAB)
    return params


if __name__ == "__main__":
    key = jax.random.PRNGKey(0)
    pkey, tkey = jax.random.split(key)
    params = make_params(pkey)
    tokens = jax.random.randint(tkey, (B, S), 0, VOCAB, dtype=jnp.int32)

    out = jax.jit(gpt_forward)(tokens, params)
    out = jax.block_until_ready(out)
    assert out.shape == (B * S, VOCAB), out.shape
    assert bool(jnp.all(jnp.isfinite(out)))
    print("KERNEL_OK")
</pallas_src>

<mosaic_0001>
module attributes {stable_mosaic.version = 11 : i64} {
  func.func @fused_gpt_kernel(%arg0: memref<16x1xi32, #tpu.memory_space<vmem>>, %arg1: memref<32x32xf32, #tpu.memory_space<vmem>>, %arg2: memref<16x32xf32, #tpu.memory_space<vmem>>, %arg3: memref<8x32x32xf32, #tpu.memory_space<vmem>>, %arg4: memref<2x32x64xf32, #tpu.memory_space<vmem>>, %arg5: memref<2x64x32xf32, #tpu.memory_space<vmem>>, %arg6: memref<24x1x32xf32, #tpu.memory_space<vmem>>, %arg7: memref<2x1x64xf32, #tpu.memory_space<vmem>>, %arg8: memref<32x32xf32, #tpu.memory_space<vmem>>, %arg9: memref<16x32xf32, #tpu.memory_space<vmem>>) attributes {dimension_semantics = [], scalar_prefetch = 0 : i64, scratch_operands = 0 : i64, tpu.core_type = #tpu.core_type<tc>} {
    %c0 = arith.constant 0 : index
    %c0_0 = arith.constant 0 : index
    %0 = vector.load %arg0[%c0, %c0_0] : memref<16x1xi32, #tpu.memory_space<vmem>>, vector<16x1xi32>
    %1 = tpu.iota {dimensions = array<i32: 1>} : vector<16x32xi32>
    %2 = vector.broadcast %0 : vector<16x1xi32> to vector<16x32xi32>
    %3 = arith.cmpi eq, %2, %1 : vector<16x32xi32>
    %4 = arith.extui %3 : vector<16x32xi1> to vector<16x32xi32>
    %5 = arith.sitofp %4 : vector<16x32xi32> to vector<16x32xf32>
    %c0_1 = arith.constant 0 : index
    %c0_2 = arith.constant 0 : index
    %6 = vector.load %arg1[%c0_1, %c0_2] : memref<32x32xf32, #tpu.memory_space<vmem>>, vector<32x32xf32>
    %cst = arith.constant dense<0.000000e+00> : vector<16x32xf32>
    %7 = tpu.matmul %5, %6, %cst {dimension_numbers = #tpu.dot_dimension_numbers<[1], [0], [0], [1], [0, 0, 1, 1], [], []>} : vector<16x32xf32>, vector<32x32xf32>, vector<16x32xf32> -> vector<16x32xf32>
    %c0_3 = arith.constant 0 : index
    %c0_4 = arith.constant 0 : index
    %8 = vector.load %arg2[%c0_3, %c0_4] : memref<16x32xf32, #tpu.memory_space<vmem>>, vector<16x32xf32>
    %9 = arith.addf %7, %8 : vector<16x32xf32>
    %10 = tpu.iota {dimensions = array<i32: 0>} : vector<16x16xi32>
    %11 = tpu.iota {dimensions = array<i32: 1>} : vector<16x16xi32>
    %c3_i32 = arith.constant 3 : i32
    %12 = vector.broadcast %c3_i32 : i32 to vector<16x16xi32>
    %13 = arith.shrsi %10, %12 : vector<16x16xi32>
    %c3_i32_5 = arith.constant 3 : i32
    %14 = vector.broadcast %c3_i32_5 : i32 to vector<16x16xi32>
    %15 = arith.shrsi %11, %14 : vector<16x16xi32>
    %16 = arith.cmpi eq, %13, %15 : vector<16x16xi32>
    %cst_6 = arith.constant 0.000000e+00 : f32
    %cst_7 = arith.constant -1.000000e+30 : f32
    %17 = vector.broadcast %cst_6 : f32 to vector<16x16xf32>
    %18 = vector.broadcast %cst_7 : f32 to vector<16x16xf32>
    %19 = arith.select %16, %17, %18 : vector<16x16xi1>, vector<16x16xf32>
    %c0_8 = arith.constant 0 : index
    %c0_9 = arith.constant 0 : index
    %c0_10 = arith.constant 0 : index
    %20 = vector.load %arg3[%c0_8, %c0_9, %c0_10] : memref<8x32x32xf32, #tpu.memory_space<vmem>>, vector<1x32x32xf32>
    %21 = vector.shape_cast %20 : vector<1x32x32xf32> to vector<32x32xf32>
    %c1 = arith.constant 1 : index
    %c0_11 = arith.constant 0 : index
    %c0_12 = arith.constant 0 : index
    %22 = vector.load %arg3[%c1, %c0_11, %c0_12] : memref<8x32x32xf32, #tpu.memory_space<vmem>>, vector<1x32x32xf32>
    %23 = vector.shape_cast %22 : vector<1x32x32xf32> to vector<32x32xf32>
    %c0_13 = arith.constant 0 : index
    %c0_14 = arith.constant 0 : index
    %c0_15 = arith.constant 0 : index
    %24 = vector.load %arg6[%c0_13, %c0_14, %c0_15] : memref<24x1x32xf32, #tpu.memory_space<vmem>>, vector<1x1x32xf32>
    %25 = vector.shape_cast %24 : vector<1x1x32xf32> to vector<1x32xf32>
    %cst_16 = arith.constant dense<0.000000e+00> : vector<16x32xf32>
    %26 = tpu.matmul %9, %21, %cst_16 {dimension_numbers = #tpu.dot_dimension_numbers<[1], [0], [0], [1], [0, 0, 1, 1], [], []>} : vector<16x32xf32>, vector<32x32xf32>, vector<16x32xf32> -> vector<16x32xf32>
    %27 = vector.broadcast %25 : vector<1x32xf32> to vector<16x32xf32>
    %28 = arith.addf %26, %27 : vector<16x32xf32>
    %cst_17 = arith.constant dense<0.000000e+00> : vector<16x16xf32>
    %29 = tpu.matmul %28, %9, %cst_17 {dimension_numbers = #tpu.dot_dimension_numbers<[1], [1], [0], [0], [0, 0, 1, 0], [], []>} : vector<16x32xf32>, vector<16x32xf32>, vector<16x16xf32> -> vector<16x16xf32>
    %30 = arith.addf %29, %19 : vector<16x16xf32>
    %cst_18 = arith.constant dense<0xFF800000> : vector<16xf32>
    %31 = vector.multi_reduction <maximumf>, %30, %cst_18 [1] : vector<16x16xf32> to vector<16xf32>
    %32 = vector.shape_cast %31 : vector<16xf32> to vector<16x1xf32>
    %33 = vector.broadcast %32 : vector<16x1xf32> to vector<16x16xf32>
    %34 = arith.subf %30, %33 : vector<16x16xf32>
    %35 = math.exp %34 : vector<16x16xf32>
    %cst_19 = arith.constant dense<0.000000e+00> : vector<16xf32>
    %36 = vector.multi_reduction <add>, %35, %cst_19 [1] : vector<16x16xf32> to vector<16xf32>
    %37 = vector.shape_cast %36 : vector<16xf32> to vector<16x1xf32>
    %38 = vector.broadcast %37 : vector<16x1xf32> to vector<16x16xf32>
    %39 = arith.divf %35, %38 : vector<16x16xf32>
    %cst_20 = arith.constant dense<0.000000e+00> : vector<16x32xf32>
    %40 = tpu.matmul %9, %23, %cst_20 {dimension_numbers = #tpu.dot_dimension_numbers<[1], [0], [0], [1], [0, 0, 1, 1], [], []>} : vector<16x32xf32>, vector<32x32xf32>, vector<16x32xf32> -> vector<16x32xf32>
    %cst_21 = arith.constant dense<0.000000e+00> : vector<16x32xf32>
    %41 = tpu.matmul %39, %40, %cst_21 {dimension_numbers = #tpu.dot_dimension_numbers<[1], [0], [0], [1], [0, 0, 1, 1], [], []>} : vector<16x16xf32>, vector<16x32xf32>, vector<16x32xf32> -> vector<16x32xf32>
    %c2 = arith.constant 2 : index
    %c0_22 = arith.constant 0 : index
    %c0_23 = arith.constant 0 : index
    %42 = vector.load %arg3[%c2, %c0_22, %c0_23] : memref<8x32x32xf32, #tpu.memory_space<vmem>>, vector<1x32x32xf32>
    %43 = vector.shape_cast %42 : vector<1x32x32xf32> to vector<32x32xf32>
    %c3 = arith.constant 3 : index
    %c0_24 = arith.constant 0 : index
    %c0_25 = arith.constant 0 : index
    %44 = vector.load %arg3[%c3, %c0_24, %c0_25] : memref<8x32x32xf32, #tpu.memory_space<vmem>>, vector<1x32x32xf32>
    %45 = vector.shape_cast %44 : vector<1x32x32xf32> to vector<32x32xf32>
    %c1_26 = arith.constant 1 : index
    %c0_27 = arith.constant 0 : index
    %c0_28 = arith.constant 0 : index
    %46 = vector.load %arg6[%c1_26, %c0_27, %c0_28] : memref<24x1x32xf32, #tpu.memory_space<vmem>>, vector<1x1x32xf32>
    %47 = vector.shape_cast %46 : vector<1x1x32xf32> to vector<1x32xf32>
    %cst_29 = arith.constant dense<0.000000e+00> : vector<16x32xf32>
    %48 = tpu.matmul %9, %43, %cst_29 {dimension_numbers = #tpu.dot_dimension_numbers<[1], [0], [0], [1], [0, 0, 1, 1], [], []>} : vector<16x32xf32>, vector<32x32xf32>, vector<16x32xf32> -> vector<16x32xf32>
    %49 = vector.broadcast %47 : vector<1x32xf32> to vector<16x32xf32>
    %50 = arith.addf %48, %49 : vector<16x32xf32>
    %cst_30 = arith.constant dense<0.000000e+00> : vector<16x16xf32>
    %51 = tpu.matmul %50, %9, %cst_30 {dimension_numbers = #tpu.dot_dimension_numbers<[1], [1], [0], [0], [0, 0, 1, 0], [], []>} : vector<16x32xf32>, vector<16x32xf32>, vector<16x16xf32> -> vector<16x16xf32>
    %52 = arith.addf %51, %19 : vector<16x16xf32>
    %cst_31 = arith.constant dense<0xFF800000> : vector<16xf32>
    %53 = vector.multi_reduction <maximumf>, %52, %cst_31 [1] : vector<16x16xf32> to vector<16xf32>
    %54 = vector.shape_cast %53 : vector<16xf32> to vector<16x1xf32>
    %55 = vector.broadcast %54 : vector<16x1xf32> to vector<16x16xf32>
    %56 = arith.subf %52, %55 : vector<16x16xf32>
    %57 = math.exp %56 : vector<16x16xf32>
    %cst_32 = arith.constant dense<0.000000e+00> : vector<16xf32>
    %58 = vector.multi_reduction <add>, %57, %cst_32 [1] : vector<16x16xf32> to vector<16xf32>
    %59 = vector.shape_cast %58 : vector<16xf32> to vector<16x1xf32>
    %60 = vector.broadcast %59 : vector<16x1xf32> to vector<16x16xf32>
    %61 = arith.divf %57, %60 : vector<16x16xf32>
    %cst_33 = arith.constant dense<0.000000e+00> : vector<16x32xf32>
    %62 = tpu.matmul %9, %45, %cst_33 {dimension_numbers = #tpu.dot_dimension_numbers<[1], [0], [0], [1], [0, 0, 1, 1], [], []>} : vector<16x32xf32>, vector<32x32xf32>, vector<16x32xf32> -> vector<16x32xf32>
    %cst_34 = arith.constant dense<0.000000e+00> : vector<16x32xf32>
    %63 = tpu.matmul %61, %62, %cst_34 {dimension_numbers = #tpu.dot_dimension_numbers<[1], [0], [0], [1], [0, 0, 1, 1], [], []>} : vector<16x16xf32>, vector<16x32xf32>, vector<16x32xf32> -> vector<16x32xf32>
    %64 = arith.addf %41, %63 : vector<16x32xf32>
    %c2_35 = arith.constant 2 : index
    %c0_36 = arith.constant 0 : index
    %c0_37 = arith.constant 0 : index
    %65 = vector.load %arg6[%c2_35, %c0_36, %c0_37] : memref<24x1x32xf32, #tpu.memory_space<vmem>>, vector<1x1x32xf32>
    %66 = vector.shape_cast %65 : vector<1x1x32xf32> to vector<1x32xf32>
    %67 = vector.broadcast %66 : vector<1x32xf32> to vector<16x32xf32>
    %68 = arith.addf %64, %67 : vector<16x32xf32>
    %69 = arith.addf %9, %68 : vector<16x32xf32>
    %c5 = arith.constant 5 : index
    %c0_38 = arith.constant 0 : index
    %c0_39 = arith.constant 0 : index
    %70 = vector.load %arg6[%c5, %c0_38, %c0_39] : memref<24x1x32xf32, #tpu.memory_space<vmem>>, vector<1x1x32xf32>
    %71 = vector.shape_cast %70 : vector<1x1x32xf32> to vector<1x32xf32>
    %c6 = arith.constant 6 : index
    %c0_40 = arith.constant 0 : index
    %c0_41 = arith.constant 0 : index
    %72 = vector.load %arg6[%c6, %c0_40, %c0_41] : memref<24x1x32xf32, #tpu.memory_space<vmem>>, vector<1x1x32xf32>
    %73 = vector.shape_cast %72 : vector<1x1x32xf32> to vector<1x32xf32>
    %cst_42 = arith.constant dense<0.000000e+00> : vector<16xf32>
    %74 = vector.multi_reduction <add>, %69, %cst_42 [1] : vector<16x32xf32> to vector<16xf32>
    %75 = vector.shape_cast %74 : vector<16xf32> to vector<16x1xf32>
    %cst_43 = arith.constant 3.200000e+01 : f32
    %76 = vector.broadcast %cst_43 : f32 to vector<16x1xf32>
    %77 = arith.divf %75, %76 : vector<16x1xf32>
    %78 = vector.broadcast %77 : vector<16x1xf32> to vector<16x32xf32>
    %79 = arith.subf %69, %78 : vector<16x32xf32>
    %80 = arith.mulf %79, %79 : vector<16x32xf32>
    %cst_44 = arith.constant dense<0.000000e+00> : vector<16xf32>
    %81 = vector.multi_reduction <add>, %80, %cst_44 [1] : vector<16x32xf32> to vector<16xf32>
    %82 = vector.shape_cast %81 : vector<16xf32> to vector<16x1xf32>
    %cst_45 = arith.constant 3.200000e+01 : f32
    %83 = vector.broadcast %cst_45 : f32 to vector<16x1xf32>
    %84 = arith.divf %82, %83 : vector<16x1xf32>
    %85 = vector.broadcast %77 : vector<16x1xf32> to vector<16x32xf32>
    %86 = arith.subf %69, %85 : vector<16x32xf32>
    %cst_46 = arith.constant 9.99999974E-6 : f32
    %87 = vector.broadcast %cst_46 : f32 to vector<16x1xf32>
    %88 = arith.addf %84, %87 : vector<16x1xf32>
    %89 = math.rsqrt %88 : vector<16x1xf32>
    %90 = vector.broadcast %89 : vector<16x1xf32> to vector<16x32xf32>
    %91 = arith.mulf %86, %90 : vector<16x32xf32>
    %92 = vector.broadcast %71 : vector<1x32xf32> to vector<16x32xf32>
    %93 = arith.mulf %91, %92 : vector<16x32xf32>
    %94 = vector.broadcast %73 : vector<1x32xf32> to vector<16x32xf32>
    %95 = arith.addf %93, %94 : vector<16x32xf32>
    %c3_47 = arith.constant 3 : index
    %c0_48 = arith.constant 0 : index
    %c0_49 = arith.constant 0 : index
    %96 = vector.load %arg6[%c3_47, %c0_48, %c0_49] : memref<24x1x32xf32, #tpu.memory_space<vmem>>, vector<1x1x32xf32>
    %97 = vector.shape_cast %96 : vector<1x1x32xf32> to vector<1x32xf32>
    %98 = vector.broadcast %97 : vector<1x32xf32> to vector<16x32xf32>
    %99 = arith.addf %95, %98 : vector<16x32xf32>
    %c7 = arith.constant 7 : index
    %c0_50 = arith.constant 0 : index
    %c0_51 = arith.constant 0 : index
    %100 = vector.load %arg6[%c7, %c0_50, %c0_51] : memref<24x1x32xf32, #tpu.memory_space<vmem>>, vector<1x1x32xf32>
    %101 = vector.shape_cast %100 : vector<1x1x32xf32> to vector<1x32xf32>
    %c8 = arith.constant 8 : index
    %c0_52 = arith.constant 0 : index
    %c0_53 = arith.constant 0 : index
    %102 = vector.load %arg6[%c8, %c0_52, %c0_53] : memref<24x1x32xf32, #tpu.memory_space<vmem>>, vector<1x1x32xf32>
    %103 = vector.shape_cast %102 : vector<1x1x32xf32> to vector<1x32xf32>
    %cst_54 = arith.constant dense<0.000000e+00> : vector<16xf32>
    %104 = vector.multi_reduction <add>, %99, %cst_54 [1] : vector<16x32xf32> to vector<16xf32>
    %105 = vector.shape_cast %104 : vector<16xf32> to vector<16x1xf32>
    %cst_55 = arith.constant 3.200000e+01 : f32
    %106 = vector.broadcast %cst_55 : f32 to vector<16x1xf32>
    %107 = arith.divf %105, %106 : vector<16x1xf32>
    %108 = vector.broadcast %107 : vector<16x1xf32> to vector<16x32xf32>
    %109 = arith.subf %99, %108 : vector<16x32xf32>
    %110 = arith.mulf %109, %109 : vector<16x32xf32>
    %cst_56 = arith.constant dense<0.000000e+00> : vector<16xf32>
    %111 = vector.multi_reduction <add>, %110, %cst_56 [1] : vector<16x32xf32> to vector<16xf32>
    %112 = vector.shape_cast %111 : vector<16xf32> to vector<16x1xf32>
    %cst_57 = arith.constant 3.200000e+01 : f32
    %113 = vector.broadcast %cst_57 : f32 to vector<16x1xf32>
    %114 = arith.divf %112, %113 : vector<16x1xf32>
    %115 = vector.broadcast %107 : vector<16x1xf32> to vector<16x32xf32>
    %116 = arith.subf %99, %115 : vector<16x32xf32>
    %cst_58 = arith.constant 9.99999974E-6 : f32
    %117 = vector.broadcast %cst_58 : f32 to vector<16x1xf32>
    %118 = arith.addf %114, %117 : vector<16x1xf32>
    %119 = math.rsqrt %118 : vector<16x1xf32>
    %120 = vector.broadcast %119 : vector<16x1xf32> to vector<16x32xf32>
    %121 = arith.mulf %116, %120 : vector<16x32xf32>
    %122 = vector.broadcast %101 : vector<1x32xf32> to vector<16x32xf32>
    %123 = arith.mulf %121, %122 : vector<16x32xf32>
    %124 = vector.broadcast %103 : vector<1x32xf32> to vector<16x32xf32>
    %125 = arith.addf %123, %124 : vector<16x32xf32>
    %c0_59 = arith.constant 0 : index
    %c0_60 = arith.constant 0 : index
    %c0_61 = arith.constant 0 : index
    %126 = vector.load %arg4[%c0_59, %c0_60, %c0_61] : memref<2x32x64xf32, #tpu.memory_space<vmem>>, vector<1x32x64xf32>
    %127 = vector.shape_cast %126 : vector<1x32x64xf32> to vector<32x64xf32>
    %cst_62 = arith.constant dense<0.000000e+00> : vector<16x64xf32>
    %128 = tpu.matmul %125, %127, %cst_62 {dimension_numbers = #tpu.dot_dimension_numbers<[1], [0], [0], [1], [0, 0, 1, 1], [], []>} : vector<16x32xf32>, vector<32x64xf32>, vector<16x64xf32> -> vector<16x64xf32>
    %c0_63 = arith.constant 0 : index
    %c0_64 = arith.constant 0 : index
    %c0_65 = arith.constant 0 : index
    %129 = vector.load %arg7[%c0_63, %c0_64, %c0_65] : memref<2x1x64xf32, #tpu.memory_space<vmem>>, vector<1x1x64xf32>
    %130 = vector.shape_cast %129 : vector<1x1x64xf32> to vector<1x64xf32>
    %131 = vector.broadcast %130 : vector<1x64xf32> to vector<16x64xf32>
    %132 = arith.addf %128, %131 : vector<16x64xf32>
    %cst_66 = arith.constant 5.000000e-01 : f32
    %133 = vector.broadcast %cst_66 : f32 to vector<16x64xf32>
    %134 = arith.mulf %133, %132 : vector<16x64xf32>
    %cst_67 = arith.constant 0.707106769 : f32
    %135 = vector.broadcast %cst_67 : f32 to vector<16x64xf32>
    %136 = arith.mulf %132, %135 : vector<16x64xf32>
    %137 = math.erf %136 : vector<16x64xf32>
    %cst_68 = arith.constant 1.000000e+00 : f32
    %138 = vector.broadcast %cst_68 : f32 to vector<16x64xf32>
    %139 = arith.addf %138, %137 : vector<16x64xf32>
    %140 = arith.mulf %134, %139 : vector<16x64xf32>
    %c0_69 = arith.constant 0 : index
    %c0_70 = arith.constant 0 : index
    %c0_71 = arith.constant 0 : index
    %141 = vector.load %arg5[%c0_69, %c0_70, %c0_71] : memref<2x64x32xf32, #tpu.memory_space<vmem>>, vector<1x64x32xf32>
    %142 = vector.shape_cast %141 : vector<1x64x32xf32> to vector<64x32xf32>
    %cst_72 = arith.constant dense<0.000000e+00> : vector<16x32xf32>
    %143 = tpu.matmul %140, %142, %cst_72 {dimension_numbers = #tpu.dot_dimension_numbers<[1], [0], [0], [1], [0, 0, 1, 1], [], []>} : vector<16x64xf32>, vector<64x32xf32>, vector<16x32xf32> -> vector<16x32xf32>
    %c4 = arith.constant 4 : index
    %c0_73 = arith.constant 0 : index
    %c0_74 = arith.constant 0 : index
    %144 = vector.load %arg6[%c4, %c0_73, %c0_74] : memref<24x1x32xf32, #tpu.memory_space<vmem>>, vector<1x1x32xf32>
    %145 = vector.shape_cast %144 : vector<1x1x32xf32> to vector<1x32xf32>
    %146 = vector.broadcast %145 : vector<1x32xf32> to vector<16x32xf32>
    %147 = arith.addf %143, %146 : vector<16x32xf32>
    %148 = arith.addf %125, %147 : vector<16x32xf32>
    %c9 = arith.constant 9 : index
    %c0_75 = arith.constant 0 : index
    %c0_76 = arith.constant 0 : index
    %149 = vector.load %arg6[%c9, %c0_75, %c0_76] : memref<24x1x32xf32, #tpu.memory_space<vmem>>, vector<1x1x32xf32>
    %150 = vector.shape_cast %149 : vector<1x1x32xf32> to vector<1x32xf32>
    %c10 = arith.constant 10 : index
    %c0_77 = arith.constant 0 : index
    %c0_78 = arith.constant 0 : index
    %151 = vector.load %arg6[%c10, %c0_77, %c0_78] : memref<24x1x32xf32, #tpu.memory_space<vmem>>, vector<1x1x32xf32>
    %152 = vector.shape_cast %151 : vector<1x1x32xf32> to vector<1x32xf32>
    %cst_79 = arith.constant dense<0.000000e+00> : vector<16xf32>
    %153 = vector.multi_reduction <add>, %148, %cst_79 [1] : vector<16x32xf32> to vector<16xf32>
    %154 = vector.shape_cast %153 : vector<16xf32> to vector<16x1xf32>
    %cst_80 = arith.constant 3.200000e+01 : f32
    %155 = vector.broadcast %cst_80 : f32 to vector<16x1xf32>
    %156 = arith.divf %154, %155 : vector<16x1xf32>
    %157 = vector.broadcast %156 : vector<16x1xf32> to vector<16x32xf32>
    %158 = arith.subf %148, %157 : vector<16x32xf32>
    %159 = arith.mulf %158, %158 : vector<16x32xf32>
    %cst_81 = arith.constant dense<0.000000e+00> : vector<16xf32>
    %160 = vector.multi_reduction <add>, %159, %cst_81 [1] : vector<16x32xf32> to vector<16xf32>
    %161 = vector.shape_cast %160 : vector<16xf32> to vector<16x1xf32>
    %cst_82 = arith.constant 3.200000e+01 : f32
    %162 = vector.broadcast %cst_82 : f32 to vector<16x1xf32>
    %163 = arith.divf %161, %162 : vector<16x1xf32>
    %164 = vector.broadcast %156 : vector<16x1xf32> to vector<16x32xf32>
    %165 = arith.subf %148, %164 : vector<16x32xf32>
    %cst_83 = arith.constant 9.99999974E-6 : f32
    %166 = vector.broadcast %cst_83 : f32 to vector<16x1xf32>
    %167 = arith.addf %163, %166 : vector<16x1xf32>
    %168 = math.rsqrt %167 : vector<16x1xf32>
    %169 = vector.broadcast %168 : vector<16x1xf32> to vector<16x32xf32>
    %170 = arith.mulf %165, %169 : vector<16x32xf32>
    %171 = vector.broadcast %150 : vector<1x32xf32> to vector<16x32xf32>
    %172 = arith.mulf %170, %171 : vector<16x32xf32>
    %173 = vector.broadcast %152 : vector<1x32xf32> to vector<16x32xf32>
    %174 = arith.addf %172, %173 : vector<16x32xf32>
    %c4_84 = arith.constant 4 : index
    %c0_85 = arith.constant 0 : index
    %c0_86 = arith.constant 0 : index
    %175 = vector.load %arg3[%c4_84, %c0_85, %c0_86] : memref<8x32x32xf32, #tpu.memory_space<vmem>>, vector<1x32x32xf32>
    %176 = vector.shape_cast %175 : vector<1x32x32xf32> to vector<32x32xf32>
    %c5_87 = arith.constant 5 : index
    %c0_88 = arith.constant 0 : index
    %c0_89 = arith.constant 0 : index
    %177 = vector.load %arg3[%c5_87, %c0_88, %c0_89] : memref<8x32x32xf32, #tpu.memory_space<vmem>>, vector<1x32x32xf32>
    %178 = vector.shape_cast %177 : vector<1x32x32xf32> to vector<32x32xf32>
    %c11 = arith.constant 11 : index
    %c0_90 = arith.constant 0 : index
    %c0_91 = arith.constant 0 : index
    %179 = vector.load %arg6[%c11, %c0_90, %c0_91] : memref<24x1x32xf32, #tpu.memory_space<vmem>>, vector<1x1x32xf32>
    %180 = vector.shape_cast %179 : vector<1x1x32xf32> to vector<1x32xf32>
    %cst_92 = arith.constant dense<0.000000e+00> : vector<16x32xf32>
    %181 = tpu.matmul %174, %176, %cst_92 {dimension_numbers = #tpu.dot_dimension_numbers<[1], [0], [0], [1], [0, 0, 1, 1], [], []>} : vector<16x32xf32>, vector<32x32xf32>, vector<16x32xf32> -> vector<16x32xf32>
    %182 = vector.broadcast %180 : vector<1x32xf32> to vector<16x32xf32>
    %183 = arith.addf %181, %182 : vector<16x32xf32>
    %cst_93 = arith.constant dense<0.000000e+00> : vector<16x16xf32>
    %184 = tpu.matmul %183, %174, %cst_93 {dimension_numbers = #tpu.dot_dimension_numbers<[1], [1], [0], [0], [0, 0, 1, 0], [], []>} : vector<16x32xf32>, vector<16x32xf32>, vector<16x16xf32> -> vector<16x16xf32>
    %185 = arith.addf %184, %19 : vector<16x16xf32>
    %cst_94 = arith.constant dense<0xFF800000> : vector<16xf32>
    %186 = vector.multi_reduction <maximumf>, %185, %cst_94 [1] : vector<16x16xf32> to vector<16xf32>
    %187 = vector.shape_cast %186 : vector<16xf32> to vector<16x1xf32>
    %188 = vector.broadcast %187 : vector<16x1xf32> to vector<16x16xf32>
    %189 = arith.subf %185, %188 : vector<16x16xf32>
    %190 = math.exp %189 : vector<16x16xf32>
    %cst_95 = arith.constant dense<0.000000e+00> : vector<16xf32>
    %191 = vector.multi_reduction <add>, %190, %cst_95 [1] : vector<16x16xf32> to vector<16xf32>
    %192 = vector.shape_cast %191 : vector<16xf32> to vector<16x1xf32>
    %193 = vector.broadcast %192 : vector<16x1xf32> to vector<16x16xf32>
    %194 = arith.divf %190, %193 : vector<16x16xf32>
    %cst_96 = arith.constant dense<0.000000e+00> : vector<16x32xf32>
    %195 = tpu.matmul %174, %178, %cst_96 {dimension_numbers = #tpu.dot_dimension_numbers<[1], [0], [0], [1], [0, 0, 1, 1], [], []>} : vector<16x32xf32>, vector<32x32xf32>, vector<16x32xf32> -> vector<16x32xf32>
    %cst_97 = arith.constant dense<0.000000e+00> : vector<16x32xf32>
    %196 = tpu.matmul %194, %195, %cst_97 {dimension_numbers = #tpu.dot_dimension_numbers<[1], [0], [0], [1], [0, 0, 1, 1], [], []>} : vector<16x16xf32>, vector<16x32xf32>, vector<16x32xf32> -> vector<16x32xf32>
    %c6_98 = arith.constant 6 : index
    %c0_99 = arith.constant 0 : index
    %c0_100 = arith.constant 0 : index
    %197 = vector.load %arg3[%c6_98, %c0_99, %c0_100] : memref<8x32x32xf32, #tpu.memory_space<vmem>>, vector<1x32x32xf32>
    %198 = vector.shape_cast %197 : vector<1x32x32xf32> to vector<32x32xf32>
    %c7_101 = arith.constant 7 : index
    %c0_102 = arith.constant 0 : index
    %c0_103 = arith.constant 0 : index
    %199 = vector.load %arg3[%c7_101, %c0_102, %c0_103] : memref<8x32x32xf32, #tpu.memory_space<vmem>>, vector<1x32x32xf32>
    %200 = vector.shape_cast %199 : vector<1x32x32xf32> to vector<32x32xf32>
    %c12 = arith.constant 12 : index
    %c0_104 = arith.constant 0 : index
    %c0_105 = arith.constant 0 : index
    %201 = vector.load %arg6[%c12, %c0_104, %c0_105] : memref<24x1x32xf32, #tpu.memory_space<vmem>>, vector<1x1x32xf32>
    %202 = vector.shape_cast %201 : vector<1x1x32xf32> to vector<1x32xf32>
    %cst_106 = arith.constant dense<0.000000e+00> : vector<16x32xf32>
    %203 = tpu.matmul %174, %198, %cst_106 {dimension_numbers = #tpu.dot_dimension_numbers<[1], [0], [0], [1], [0, 0, 1, 1], [], []>} : vector<16x32xf32>, vector<32x32xf32>, vector<16x32xf32> -> vector<16x32xf32>
    %204 = vector.broadcast %202 : vector<1x32xf32> to vector<16x32xf32>
    %205 = arith.addf %203, %204 : vector<16x32xf32>
    %cst_107 = arith.constant dense<0.000000e+00> : vector<16x16xf32>
    %206 = tpu.matmul %205, %174, %cst_107 {dimension_numbers = #tpu.dot_dimension_numbers<[1], [1], [0], [0], [0, 0, 1, 0], [], []>} : vector<16x32xf32>, vector<16x32xf32>, vector<16x16xf32> -> vector<16x16xf32>
    %207 = arith.addf %206, %19 : vector<16x16xf32>
    %cst_108 = arith.constant dense<0xFF800000> : vector<16xf32>
    %208 = vector.multi_reduction <maximumf>, %207, %cst_108 [1] : vector<16x16xf32> to vector<16xf32>
    %209 = vector.shape_cast %208 : vector<16xf32> to vector<16x1xf32>
    %210 = vector.broadcast %209 : vector<16x1xf32> to vector<16x16xf32>
    %211 = arith.subf %207, %210 : vector<16x16xf32>
    %212 = math.exp %211 : vector<16x16xf32>
    %cst_109 = arith.constant dense<0.000000e+00> : vector<16xf32>
    %213 = vector.multi_reduction <add>, %212, %cst_109 [1] : vector<16x16xf32> to vector<16xf32>
    %214 = vector.shape_cast %213 : vector<16xf32> to vector<16x1xf32>
    %215 = vector.broadcast %214 : vector<16x1xf32> to vector<16x16xf32>
    %216 = arith.divf %212, %215 : vector<16x16xf32>
    %cst_110 = arith.constant dense<0.000000e+00> : vector<16x32xf32>
    %217 = tpu.matmul %174, %200, %cst_110 {dimension_numbers = #tpu.dot_dimension_numbers<[1], [0], [0], [1], [0, 0, 1, 1], [], []>} : vector<16x32xf32>, vector<32x32xf32>, vector<16x32xf32> -> vector<16x32xf32>
    %cst_111 = arith.constant dense<0.000000e+00> : vector<16x32xf32>
    %218 = tpu.matmul %216, %217, %cst_111 {dimension_numbers = #tpu.dot_dimension_numbers<[1], [0], [0], [1], [0, 0, 1, 1], [], []>} : vector<16x16xf32>, vector<16x32xf32>, vector<16x32xf32> -> vector<16x32xf32>
    %219 = arith.addf %196, %218 : vector<16x32xf32>
    %c13 = arith.constant 13 : index
    %c0_112 = arith.constant 0 : index
    %c0_113 = arith.constant 0 : index
    %220 = vector.load %arg6[%c13, %c0_112, %c0_113] : memref<24x1x32xf32, #tpu.memory_space<vmem>>, vector<1x1x32xf32>
    %221 = vector.shape_cast %220 : vector<1x1x32xf32> to vector<1x32xf32>
    %222 = vector.broadcast %221 : vector<1x32xf32> to vector<16x32xf32>
    %223 = arith.addf %219, %222 : vector<16x32xf32>
    %224 = arith.addf %174, %223 : vector<16x32xf32>
    %c16 = arith.constant 16 : index
    %c0_114 = arith.constant 0 : index
    %c0_115 = arith.constant 0 : index
    %225 = vector.load %arg6[%c16, %c0_114, %c0_115] : memref<24x1x32xf32, #tpu.memory_space<vmem>>, vector<1x1x32xf32>
    %226 = vector.shape_cast %225 : vector<1x1x32xf32> to vector<1x32xf32>
    %c17 = arith.constant 17 : index
    %c0_116 = arith.constant 0 : index
    %c0_117 = arith.constant 0 : index
    %227 = vector.load %arg6[%c17, %c0_116, %c0_117] : memref<24x1x32xf32, #tpu.memory_space<vmem>>, vector<1x1x32xf32>
    %228 = vector.shape_cast %227 : vector<1x1x32xf32> to vector<1x32xf32>
    %cst_118 = arith.constant dense<0.000000e+00> : vector<16xf32>
    %229 = vector.multi_reduction <add>, %224, %cst_118 [1] : vector<16x32xf32> to vector<16xf32>
    %230 = vector.shape_cast %229 : vector<16xf32> to vector<16x1xf32>
    %cst_119 = arith.constant 3.200000e+01 : f32
    %231 = vector.broadcast %cst_119 : f32 to vector<16x1xf32>
    %232 = arith.divf %230, %231 : vector<16x1xf32>
    %233 = vector.broadcast %232 : vector<16x1xf32> to vector<16x32xf32>
    %234 = arith.subf %224, %233 : vector<16x32xf32>
    %235 = arith.mulf %234, %234 : vector<16x32xf32>
    %cst_120 = arith.constant dense<0.000000e+00> : vector<16xf32>
    %236 = vector.multi_reduction <add>, %235, %cst_120 [1] : vector<16x32xf32> to vector<16xf32>
    %237 = vector.shape_cast %236 : vector<16xf32> to vector<16x1xf32>
    %cst_121 = arith.constant 3.200000e+01 : f32
    %238 = vector.broadcast %cst_121 : f32 to vector<16x1xf32>
    %239 = arith.divf %237, %238 : vector<16x1xf32>
    %240 = vector.broadcast %232 : vector<16x1xf32> to vector<16x32xf32>
    %241 = arith.subf %224, %240 : vector<16x32xf32>
    %cst_122 = arith.constant 9.99999974E-6 : f32
    %242 = vector.broadcast %cst_122 : f32 to vector<16x1xf32>
    %243 = arith.addf %239, %242 : vector<16x1xf32>
    %244 = math.rsqrt %243 : vector<16x1xf32>
    %245 = vector.broadcast %244 : vector<16x1xf32> to vector<16x32xf32>
    %246 = arith.mulf %241, %245 : vector<16x32xf32>
    %247 = vector.broadcast %226 : vector<1x32xf32> to vector<16x32xf32>
    %248 = arith.mulf %246, %247 : vector<16x32xf32>
    %249 = vector.broadcast %228 : vector<1x32xf32> to vector<16x32xf32>
    %250 = arith.addf %248, %249 : vector<16x32xf32>
    %c14 = arith.constant 14 : index
    %c0_123 = arith.constant 0 : index
    %c0_124 = arith.constant 0 : index
    %251 = vector.load %arg6[%c14, %c0_123, %c0_124] : memref<24x1x32xf32, #tpu.memory_space<vmem>>, vector<1x1x32xf32>
    %252 = vector.shape_cast %251 : vector<1x1x32xf32> to vector<1x32xf32>
    %253 = vector.broadcast %252 : vector<1x32xf32> to vector<16x32xf32>
    %254 = arith.addf %250, %253 : vector<16x32xf32>
    %c18 = arith.constant 18 : index
    %c0_125 = arith.constant 0 : index
    %c0_126 = arith.constant 0 : index
    %255 = vector.load %arg6[%c18, %c0_125, %c0_126] : memref<24x1x32xf32, #tpu.memory_space<vmem>>, vector<1x1x32xf32>
    %256 = vector.shape_cast %255 : vector<1x1x32xf32> to vector<1x32xf32>
    %c19 = arith.constant 19 : index
    %c0_127 = arith.constant 0 : index
    %c0_128 = arith.constant 0 : index
    %257 = vector.load %arg6[%c19, %c0_127, %c0_128] : memref<24x1x32xf32, #tpu.memory_space<vmem>>, vector<1x1x32xf32>
    %258 = vector.shape_cast %257 : vector<1x1x32xf32> to vector<1x32xf32>
    %cst_129 = arith.constant dense<0.000000e+00> : vector<16xf32>
    %259 = vector.multi_reduction <add>, %254, %cst_129 [1] : vector<16x32xf32> to vector<16xf32>
    %260 = vector.shape_cast %259 : vector<16xf32> to vector<16x1xf32>
    %cst_130 = arith.constant 3.200000e+01 : f32
    %261 = vector.broadcast %cst_130 : f32 to vector<16x1xf32>
    %262 = arith.divf %260, %261 : vector<16x1xf32>
    %263 = vector.broadcast %262 : vector<16x1xf32> to vector<16x32xf32>
    %264 = arith.subf %254, %263 : vector<16x32xf32>
    %265 = arith.mulf %264, %264 : vector<16x32xf32>
    %cst_131 = arith.constant dense<0.000000e+00> : vector<16xf32>
    %266 = vector.multi_reduction <add>, %265, %cst_131 [1] : vector<16x32xf32> to vector<16xf32>
    %267 = vector.shape_cast %266 : vector<16xf32> to vector<16x1xf32>
    %cst_132 = arith.constant 3.200000e+01 : f32
    %268 = vector.broadcast %cst_132 : f32 to vector<16x1xf32>
    %269 = arith.divf %267, %268 : vector<16x1xf32>
    %270 = vector.broadcast %262 : vector<16x1xf32> to vector<16x32xf32>
    %271 = arith.subf %254, %270 : vector<16x32xf32>
    %cst_133 = arith.constant 9.99999974E-6 : f32
    %272 = vector.broadcast %cst_133 : f32 to vector<16x1xf32>
    %273 = arith.addf %269, %272 : vector<16x1xf32>
    %274 = math.rsqrt %273 : vector<16x1xf32>
    %275 = vector.broadcast %274 : vector<16x1xf32> to vector<16x32xf32>
    %276 = arith.mulf %271, %275 : vector<16x32xf32>
    %277 = vector.broadcast %256 : vector<1x32xf32> to vector<16x32xf32>
    %278 = arith.mulf %276, %277 : vector<16x32xf32>
    %279 = vector.broadcast %258 : vector<1x32xf32> to vector<16x32xf32>
    %280 = arith.addf %278, %279 : vector<16x32xf32>
    %c1_134 = arith.constant 1 : index
    %c0_135 = arith.constant 0 : index
    %c0_136 = arith.constant 0 : index
    %281 = vector.load %arg4[%c1_134, %c0_135, %c0_136] : memref<2x32x64xf32, #tpu.memory_space<vmem>>, vector<1x32x64xf32>
    %282 = vector.shape_cast %281 : vector<1x32x64xf32> to vector<32x64xf32>
    %cst_137 = arith.constant dense<0.000000e+00> : vector<16x64xf32>
    %283 = tpu.matmul %280, %282, %cst_137 {dimension_numbers = #tpu.dot_dimension_numbers<[1], [0], [0], [1], [0, 0, 1, 1], [], []>} : vector<16x32xf32>, vector<32x64xf32>, vector<16x64xf32> -> vector<16x64xf32>
    %c1_138 = arith.constant 1 : index
    %c0_139 = arith.constant 0 : index
    %c0_140 = arith.constant 0 : index
    %284 = vector.load %arg7[%c1_138, %c0_139, %c0_140] : memref<2x1x64xf32, #tpu.memory_space<vmem>>, vector<1x1x64xf32>
    %285 = vector.shape_cast %284 : vector<1x1x64xf32> to vector<1x64xf32>
    %286 = vector.broadcast %285 : vector<1x64xf32> to vector<16x64xf32>
    %287 = arith.addf %283, %286 : vector<16x64xf32>
    %cst_141 = arith.constant 5.000000e-01 : f32
    %288 = vector.broadcast %cst_141 : f32 to vector<16x64xf32>
    %289 = arith.mulf %288, %287 : vector<16x64xf32>
    %cst_142 = arith.constant 0.707106769 : f32
    %290 = vector.broadcast %cst_142 : f32 to vector<16x64xf32>
    %291 = arith.mulf %287, %290 : vector<16x64xf32>
    %292 = math.erf %291 : vector<16x64xf32>
    %cst_143 = arith.constant 1.000000e+00 : f32
    %293 = vector.broadcast %cst_143 : f32 to vector<16x64xf32>
    %294 = arith.addf %293, %292 : vector<16x64xf32>
    %295 = arith.mulf %289, %294 : vector<16x64xf32>
    %c1_144 = arith.constant 1 : index
    %c0_145 = arith.constant 0 : index
    %c0_146 = arith.constant 0 : index
    %296 = vector.load %arg5[%c1_144, %c0_145, %c0_146] : memref<2x64x32xf32, #tpu.memory_space<vmem>>, vector<1x64x32xf32>
    %297 = vector.shape_cast %296 : vector<1x64x32xf32> to vector<64x32xf32>
    %cst_147 = arith.constant dense<0.000000e+00> : vector<16x32xf32>
    %298 = tpu.matmul %295, %297, %cst_147 {dimension_numbers = #tpu.dot_dimension_numbers<[1], [0], [0], [1], [0, 0, 1, 1], [], []>} : vector<16x64xf32>, vector<64x32xf32>, vector<16x32xf32> -> vector<16x32xf32>
    %c15 = arith.constant 15 : index
    %c0_148 = arith.constant 0 : index
    %c0_149 = arith.constant 0 : index
    %299 = vector.load %arg6[%c15, %c0_148, %c0_149] : memref<24x1x32xf32, #tpu.memory_space<vmem>>, vector<1x1x32xf32>
    %300 = vector.shape_cast %299 : vector<1x1x32xf32> to vector<1x32xf32>
    %301 = vector.broadcast %300 : vector<1x32xf32> to vector<16x32xf32>
    %302 = arith.addf %298, %301 : vector<16x32xf32>
    %303 = arith.addf %280, %302 : vector<16x32xf32>
    %c20 = arith.constant 20 : index
    %c0_150 = arith.constant 0 : index
    %c0_151 = arith.constant 0 : index
    %304 = vector.load %arg6[%c20, %c0_150, %c0_151] : memref<24x1x32xf32, #tpu.memory_space<vmem>>, vector<1x1x32xf32>
    %305 = vector.shape_cast %304 : vector<1x1x32xf32> to vector<1x32xf32>
    %c21 = arith.constant 21 : index
    %c0_152 = arith.constant 0 : index
    %c0_153 = arith.constant 0 : index
    %306 = vector.load %arg6[%c21, %c0_152, %c0_153] : memref<24x1x32xf32, #tpu.memory_space<vmem>>, vector<1x1x32xf32>
    %307 = vector.shape_cast %306 : vector<1x1x32xf32> to vector<1x32xf32>
    %cst_154 = arith.constant dense<0.000000e+00> : vector<16xf32>
    %308 = vector.multi_reduction <add>, %303, %cst_154 [1] : vector<16x32xf32> to vector<16xf32>
    %309 = vector.shape_cast %308 : vector<16xf32> to vector<16x1xf32>
    %cst_155 = arith.constant 3.200000e+01 : f32
    %310 = vector.broadcast %cst_155 : f32 to vector<16x1xf32>
    %311 = arith.divf %309, %310 : vector<16x1xf32>
    %312 = vector.broadcast %311 : vector<16x1xf32> to vector<16x32xf32>
    %313 = arith.subf %303, %312 : vector<16x32xf32>
    %314 = arith.mulf %313, %313 : vector<16x32xf32>
    %cst_156 = arith.constant dense<0.000000e+00> : vector<16xf32>
    %315 = vector.multi_reduction <add>, %314, %cst_156 [1] : vector<16x32xf32> to vector<16xf32>
    %316 = vector.shape_cast %315 : vector<16xf32> to vector<16x1xf32>
    %cst_157 = arith.constant 3.200000e+01 : f32
    %317 = vector.broadcast %cst_157 : f32 to vector<16x1xf32>
    %318 = arith.divf %316, %317 : vector<16x1xf32>
    %319 = vector.broadcast %311 : vector<16x1xf32> to vector<16x32xf32>
    %320 = arith.subf %303, %319 : vector<16x32xf32>
    %cst_158 = arith.constant 9.99999974E-6 : f32
    %321 = vector.broadcast %cst_158 : f32 to vector<16x1xf32>
    %322 = arith.addf %318, %321 : vector<16x1xf32>
    %323 = math.rsqrt %322 : vector<16x1xf32>
    %324 = vector.broadcast %323 : vector<16x1xf32> to vector<16x32xf32>
    %325 = arith.mulf %320, %324 : vector<16x32xf32>
    %326 = vector.broadcast %305 : vector<1x32xf32> to vector<16x32xf32>
    %327 = arith.mulf %325, %326 : vector<16x32xf32>
    %328 = vector.broadcast %307 : vector<1x32xf32> to vector<16x32xf32>
    %329 = arith.addf %327, %328 : vector<16x32xf32>
    %c22 = arith.constant 22 : index
    %c0_159 = arith.constant 0 : index
    %c0_160 = arith.constant 0 : index
    %330 = vector.load %arg6[%c22, %c0_159, %c0_160] : memref<24x1x32xf32, #tpu.memory_space<vmem>>, vector<1x1x32xf32>
    %331 = vector.shape_cast %330 : vector<1x1x32xf32> to vector<1x32xf32>
    %c23 = arith.constant 23 : index
    %c0_161 = arith.constant 0 : index
    %c0_162 = arith.constant 0 : index
    %332 = vector.load %arg6[%c23, %c0_161, %c0_162] : memref<24x1x32xf32, #tpu.memory_space<vmem>>, vector<1x1x32xf32>
    %333 = vector.shape_cast %332 : vector<1x1x32xf32> to vector<1x32xf32>
    %cst_163 = arith.constant dense<0.000000e+00> : vector<16xf32>
    %334 = vector.multi_reduction <add>, %329, %cst_163 [1] : vector<16x32xf32> to vector<16xf32>
    %335 = vector.shape_cast %334 : vector<16xf32> to vector<16x1xf32>
    %cst_164 = arith.constant 3.200000e+01 : f32
    %336 = vector.broadcast %cst_164 : f32 to vector<16x1xf32>
    %337 = arith.divf %335, %336 : vector<16x1xf32>
    %338 = vector.broadcast %337 : vector<16x1xf32> to vector<16x32xf32>
    %339 = arith.subf %329, %338 : vector<16x32xf32>
    %340 = arith.mulf %339, %339 : vector<16x32xf32>
    %cst_165 = arith.constant dense<0.000000e+00> : vector<16xf32>
    %341 = vector.multi_reduction <add>, %340, %cst_165 [1] : vector<16x32xf32> to vector<16xf32>
    %342 = vector.shape_cast %341 : vector<16xf32> to vector<16x1xf32>
    %cst_166 = arith.constant 3.200000e+01 : f32
    %343 = vector.broadcast %cst_166 : f32 to vector<16x1xf32>
    %344 = arith.divf %342, %343 : vector<16x1xf32>
    %345 = vector.broadcast %337 : vector<16x1xf32> to vector<16x32xf32>
    %346 = arith.subf %329, %345 : vector<16x32xf32>
    %cst_167 = arith.constant 9.99999974E-6 : f32
    %347 = vector.broadcast %cst_167 : f32 to vector<16x1xf32>
    %348 = arith.addf %344, %347 : vector<16x1xf32>
    %349 = math.rsqrt %348 : vector<16x1xf32>
    %350 = vector.broadcast %349 : vector<16x1xf32> to vector<16x32xf32>
    %351 = arith.mulf %346, %350 : vector<16x32xf32>
    %352 = vector.broadcast %331 : vector<1x32xf32> to vector<16x32xf32>
    %353 = arith.mulf %351, %352 : vector<16x32xf32>
    %354 = vector.broadcast %333 : vector<1x32xf32> to vector<16x32xf32>
    %355 = arith.addf %353, %354 : vector<16x32xf32>
    %c0_168 = arith.constant 0 : index
    %c0_169 = arith.constant 0 : index
    %356 = vector.load %arg8[%c0_168, %c0_169] : memref<32x32xf32, #tpu.memory_space<vmem>>, vector<32x32xf32>
    %cst_170 = arith.constant dense<0.000000e+00> : vector<16x32xf32>
    %357 = tpu.matmul %355, %356, %cst_170 {dimension_numbers = #tpu.dot_dimension_numbers<[1], [0], [0], [1], [0, 0, 1, 1], [], []>} : vector<16x32xf32>, vector<32x32xf32>, vector<16x32xf32> -> vector<16x32xf32>
    %c0_171 = arith.constant 0 : index
    %c0_172 = arith.constant 0 : index
    %358 = vector.load %arg9[%c0_171, %c0_172] : memref<16x32xf32, #tpu.memory_space<vmem>>, vector<16x32xf32>
    tpu.vector_store %arg9[%c0_171, %c0_172], %357 {strides = array<i32>} : memref<16x32xf32, #tpu.memory_space<vmem>>, vector<16x32xf32>,
    return
  }
}

</mosaic_0001>

<bundles_post_ra>
// kernel: gpt_forward.1
= control target key start
LH: loop header
LB: loop body
LE: loop exit
PB: predicated region body
PF: predicated region fallthrough
CT: control target
= control target key end

     0   :  { %14 = vsyncpa [#allocation3], 0  ;;  %s2406_s0 = inlined_call_operand.vmem [shape: s32[16,1], index: 0, kind: input, shape index: {}]   ;;  %s2407_s1 = inlined_call_operand.vmem [shape: f32[32,32], index: 1, kind: input, shape index: {}]   ;;  %s2408_s2 = inlined_call_operand.vmem [shape: f32[16,32], index: 2, kind: input, shape index: {}]   ;;  %s2409_s3 = inlined_call_operand.hbm [shape: f32[8,32,32], index: 3, kind: input, shape index: {}]   ;;  %s2410_s4 = inlined_call_operand.vmem [shape: f32[2,32,64], index: 4, kind: input, shape index: {}]   ;;  %s2411_s5 = inlined_call_operand.vmem [shape: f32[2,64,32], index: 5, kind: input, shape index: {}]   ;;  %s2412_s6 = inlined_call_operand.vmem [shape: f32[24,1,32], index: 6, kind: input, shape index: {}]   ;;  %s2413_s7 = inlined_call_operand.vmem [shape: f32[2,1,64], index: 7, kind: input, shape index: {}]   ;;  %s2414_s8 = inlined_call_operand.vmem [shape: f32[32,32], index: 8, kind: input, shape index: {}]   ;;  %s2415_s9 = inlined_call_operand.hbm [shape: f32[16,32], index: 9, kind: output, shape index: {}]  }
   0x1   :  { %15 = vsyncpa [#allocation4], 0  ;;  %s26_s11 = sshll.u32 %s2409_s3, 4  ;;  %s1890_s12 = smov [#allocation2]   ;;  %s27_s11 = int_to_ptr.hbm [resolvable:$true] %s26_s11 }
   0x2   :  { %s28_s13 = sshll.u32 %s1890_s12, 4  ;;  %s1891_s14 = smov 128   ;;  %s29_s13 = int_to_ptr.vmem [resolvable:$true] %s28_s13 }
   0x3   :  { %s1892_s15 = smov 8  }
   0x4   :  { %34 = dma.hbm_to_vmem [thread:$0]  %s27_s11, 4096, %s29_s13, [#allocation3], %s1891_s14, %s1891_s14, %s1892_s15  }
   0x5   :  { %1886 = dma.done.wait [#allocation3], 4096  }
   0x6   :  { %1887 = vsyncadd [#allocation3], 4294963200  ;;  %v1893_v0 = vmov 0   ;;  %v50_v1 = vld [vmem:[%s2406_s0 + $0x8] sm:$0xff]  ;;  %v68_v2 = vld [vmem:[%s2407_s1 + $0x18] sm:$0xff]  ;;  %v51_v11 = vlaneseq  ;;  %vm71_vm0 = vcmask 261120  }
   0x7   :  { %1741 = vset.pattern.permute.xlu0 %v1893_v0  ;;  %1725 = vmatpush.msra.mxu2 %v68_v2  ;;  %v67_v3 = vld [vmem:[%s2407_s1 + $0x10] sm:$0xff]  ;;  %v66_v4 = vld [vmem:[%s2407_s1 + $0x8] sm:$0xff]  ;;  %v49_v5 = vld [vmem:[%s2406_s0] sm:$0xff]  ;;  %v1894_v14 = vmov 0.0   ;;  %v1895_v52 = vmov -1e+30  }
   0x8   :  { %57 = vperm.xlu0 %1741, %v50_v1   ;;  %90 = vmatpush.msra.mxu0 %v68_v2  ;;  %v65_v6 = vld [vmem:[%s2407_s1] sm:$0xff]  ;;  %v114_v7 = vld [vmem:[#allocation2 + $0x18] sm:$0xff]  ;;  %v113_v9 = vld [vmem:[#allocation2 + $0x10] sm:$0xff]  ;;  %v1973_v12 = vand.u32 127, %v51_v11  ;;  %v102_v48 = vshrl.u32 %v51_v11, 7  ;;  %vm182_vm4 = vcmask 130048  }
   0x9   :  { %1726 = vmatpush.msra.mxu2 %v67_v3  ;;  %v258_v8 = vld [vmem:[#allocation2 + $0x58] sm:$0xff]  ;;  %142 = vmatpush.msra.mxu1 %v114_v7  ;;  %v257_v10 = vld [vmem:[#allocation2 + $0x50] sm:$0xff]  ;;  %v112_v18 = vld [vmem:[#allocation2 + $0x8] sm:$0xff]  ;;  %s1618_s21 = sshll.u32 %s2415_s9, 4  ;;  %s1619_s21 = int_to_ptr.hbm [resolvable:$true] %s1618_s21 }
   0xa   :  { %91 = vmatpush.msra.mxu0 %v67_v3  ;;  %1729 = vmatpush.msra.mxu3 %v114_v7  ;;  %v256_v19 = vld [vmem:[#allocation2 + $0x48] sm:$0xff]  ;;  %v111_v20 = vld [vmem:[#allocation2] sm:$0xff]  ;;  %v119_v22 = vld [vmem:[#allocation2 + $0x38] sm:$0xff]  ;;  %v104_v49 = vshra.s32 %v102_v48, 3  ;;  %v106_v50 = vshra.s32 %v1973_v12, 3  ;;  %v103_v51 = vadd.s32 8, %v102_v48 }
   0xb   :  { %1727 = vmatpush.msra.mxu2 %v66_v4  ;;  %143 = vmatpush.msra.mxu1 %v113_v9  ;;  %v255_v21 = vld [vmem:[#allocation2 + $0x40] sm:$0xff]  ;;  %v118_v23 = vld [vmem:[#allocation2 + $0x30] sm:$0xff]  ;;  %v117_v24 = vld [vmem:[#allocation2 + $0x28] sm:$0xff] }
   0xc   :  { %92 = vmatpush.msra.mxu0 %v66_v4  ;;  %1730 = vmatpush.msra.mxu3 %v113_v9  ;;  %v116_v25 = vld [vmem:[#allocation2 + $0x20] sm:$0xff]  ;;  %v70_v26 = vld [vmem:[%s2408_s2 + $0x8] sm:$0xff]  ;;  %v263_v32 = vld [vmem:[#allocation2 + $0x78] sm:$0xff]  ;;  %vm107_vm3 = vcmp.eq.s32.totalorder %v104_v49, %v106_v50  ;;  %v105_v54 = vshra.s32 %v103_v51, 3 }
   0xd   :  { %1728 = vmatpush.msra.mxu2 %v65_v6  ;;  %144 = vmatpush.msra.mxu1 %v112_v18  ;;  %v69_v28 = vld [vmem:[%s2408_s2] sm:$0xff]  ;;  %v262_v33 = vld [vmem:[#allocation2 + $0x70] sm:$0xff]  ;;  %v261_v34 = vld [vmem:[#allocation2 + $0x68] sm:$0xff]  ;;  %v2025_v53 = vsel %vm107_vm3, 0.0, %v1895_v52 }
   0xe   :  { %93 = vmatpush.msra.mxu0 %v65_v6  ;;  %1731 = vmatpush.msra.mxu3 %v112_v18  ;;  %v260_v35 = vld [vmem:[#allocation2 + $0x60] sm:$0xff]  ;;  %vm108_vm5 = vcmp.eq.s32.totalorder %v105_v54, %v106_v50 }
   0xf   :  { %145 = vmatpush.msra.mxu1 %v111_v20  ;;  %v1742_v36 = vld [vmem:[%s2412_s6] ss:$0 sm:$0xff]  ;;  %v1743_v37 = vld [vmem:[%s2412_s6 + $0x1] ss:$0 sm:$0xff]  ;;  %v2029_v59 = vsel %vm108_vm5, 0.0, %v1895_v52 }
  0x10   :  { %54 = vperm.xlu0 %1741, %v49_v5   ;;  %281 = vmatpush.msrb.mxu0 %v258_v8 }
  0x11   :  { %1732 = vmatpush.msra.mxu3 %v111_v20 }
  0x12   :  { %282 = vmatpush.msrb.mxu0 %v257_v10 }
  0x13   :  { %243 = vmatpush.msrb.mxu3 %v119_v22 }
  0x14   :  { %283 = vmatpush.msrb.mxu0 %v256_v19 }
  0x15   :  { %244 = vmatpush.msrb.mxu3 %v118_v23 }
  0x16   :  { %284 = vmatpush.msrb.mxu0 %v255_v21 }
  0x17   :  { %245 = vmatpush.msrb.mxu3 %v117_v24 }
  0x19   :  { %246 = vmatpush.msrb.mxu3 %v116_v25 }
  0x7a   :  { %v58_v13 = vpop.permute.xlu0 %57 }
  0x7b   :  { %vm60_vm1 = vcmp.eq.s32.totalorder %v58_v13, %v1973_v12 }
  0x7c   :  { %v1632_v15 = vsel %vm60_vm1, 1.0, %v1894_v14 }
  0x7d   :  { %1634 = vmatmul.msk.f32.vlgmr.msra.gmra.mxu2 %vm71_vm0, %v1632_v15 }
  0x82   :  { %v55_v16 = vpop.permute.xlu0 %54 }
  0x83   :  { %vm59_vm2 = vcmp.eq.s32.totalorder %v55_v16, %v1973_v12 }
  0x84   :  { %v1631_v17 = vsel %vm59_vm2, 1.0, %v1894_v14 }
  0x85   :  { %1633 = vmatmul.msk.f32.vlgmr.msra.gmra.mxu0 %vm71_vm0, %v1631_v17 }
 0x100   :  { %v98_v27 = vpop.f32.mrf.mxu2 }
 0x101   :  { %v1985_v29 = vadd.f32 %v98_v27, %v70_v26 }
 0x102   :  { %v95_v30 = vpop.f32.mrf.mxu0 }
 0x103   :  { %v1987_v31 = vadd.f32 %v95_v30, %v69_v28  ;;  %1636 = vmatmul.msk.f32.vlgmr.msra.gmra.mxu3 %vm71_vm0, %v1985_v29  ;;  %1637 = vmatpush.xpose.msk.msrb.mxu2 %vm71_vm0, %v1985_v29 }
 0x104   :  { %1646 = vmatpush.xpose.msk.msrb.mxu1 %vm71_vm0, %v1985_v29 }
 0x105   :  { %1635 = vmatmul.msk.f32.vlgmr.msra.gmra.mxu1 %vm71_vm0, %v1987_v31  ;;  %1644 = vmatmul.msk.f32.vlgmr.msrb.gmra.mxu0 %vm71_vm0, %v1987_v31 }
 0x107   :  { %1638 = vmatpush.xpose.msk.msrb.mxu2 %vm71_vm0, %v1987_v31 }
 0x108   :  { %1647 = vmatpush.xpose.msk.msrb.mxu1 %vm71_vm0, %v1987_v31 }
 0x10b   :  { %1641 = vmatmul.msk.f32.vlgmr.msrb.gmra.mxu3 %vm71_vm0, %v1987_v31  ;;  %381 = vmatpush.msra.mxu2 %v263_v32 }
 0x10d   :  { %1645 = vmatmul.msk.f32.gmra.mxu0 %vm71_vm0, %v1985_v29  ;;  %382 = vmatpush.msra.mxu2 %v262_v33 }
 0x10f   :  { %383 = vmatpush.msra.mxu2 %v261_v34 }
 0x111   :  { %384 = vmatpush.msra.mxu2 %v260_v35 }
 0x113   :  { %1642 = vmatmul.msk.f32.gmra.mxu3 %vm71_vm0, %v1985_v29 }
 0x182   :  { %v147_v38 = vpop.f32.mrf.mxu1  ;;  %v286_v39 = vpop.f32.mrf.mxu0 }
 0x183   :  { %v148_v40 = vadd.f32 %v1742_v36, %v147_v38  ;;  %v287_v41 = vadd.f32 %v1743_v37, %v286_v39 }
 0x185   :  { %1639 = vmatmul.msk.f32.vlgmr.msrb.gmra.mxu2 %vm71_vm0, %v148_v40  ;;  %1648 = vmatmul.msk.f32.vlgmr.msrb.gmra.mxu1 %vm71_vm0, %v287_v41 }
 0x186   :  { %v150_v42 = vpop.f32.mrf.mxu3 }
 0x187   :  { %v151_v44 = vadd.f32 %v1742_v36, %v150_v42 }
 0x18a   :  { %v289_v43 = vpop.f32.mrf.mxu0 }
 0x18b   :  { %v290_v45 = vadd.f32 %v1743_v37, %v289_v43 }
 0x18d   :  { %1640 = vmatmul.msk.f32.gmra.mxu2 %vm71_vm0, %v151_v44  ;;  %1649 = vmatmul.msk.f32.gmra.mxu1 %vm71_vm0, %v290_v45 }
 0x18e   :  { %v248_v46 = vpop.f32.mrf.mxu3 }
 0x195   :  { %1650 = vmatmul.msk.f32.vlgmr.msra.gmra.mxu2 %vm71_vm0, %v1987_v31 }
 0x196   :  { %v251_v47 = vpop.f32.mrf.mxu3 }
 0x197   :  { %441 = vmatpush.msra.mxu0 %v251_v47 }
 0x199   :  { %442 = vmatpush.msra.mxu0 %v248_v46 }
 0x19d   :  { %1651 = vmatmul.msk.f32.gmra.mxu2 %vm71_vm0, %v1985_v29 }
 0x202   :  { %v315_v55 = vpop.f32.mrf.mxu1 }
 0x203   :  { %v316_v56 = vadd.f32 %v315_v55, %v2025_v53 }
 0x205   :  { %v321_v57 = vsel %vm182_vm4, %v316_v56, -inf }
 0x206   :  { %322 = vmax.xlane.f32.xlu1 %v321_v57 }
 0x208   :  { %v176_v58 = vpop.f32.mrf.mxu2 }
 0x209   :  { %v177_v60 = vadd.f32 %v176_v58, %v2025_v53 }
 0x20a   :  { %v318_v61 = vpop.f32.mrf.mxu1 }
 0x20b   :  { %v319_v62 = vadd.f32 %v318_v61, %v2029_v59  ;;  %v183_v0 = vsel %vm182_vm4, %v177_v60, -inf }
 0x20d   :  { %v324_v63 = vsel %vm182_vm4, %v319_v62, -inf }
 0x20e   :  { %325 = vmax.xlane.f32.xlu2 %v324_v63  ;;  %184 = vmax.xlane.f32.xlu1 %v183_v0 }
 0x210   :  { %v179_v1 = vpop.f32.mrf.mxu2 }
 0x211   :  { %v180_v2 = vadd.f32 %v179_v1, %v2029_v59 }
 0x213   :  { %v186_v3 = vsel %vm182_vm4, %v180_v2, -inf }
 0x216   :  { %187 = vmax.xlane.f32.xlu2 %v186_v3 }
 0x218   :  { %v386_v4 = vpop.f32.mrf.mxu2 }
 0x220   :  { %v389_v5 = vpop.f32.mrf.mxu2 }
 0x221   :  { %412 = vmatpush.msra.mxu3 %v389_v5 }
 0x223   :  { %413 = vmatpush.msra.mxu3 %v386_v4 }
 0x279   :  { %v323_v6 = vpop.xlane.xlu1 %322 }
 0x27a   :  { %v327_v7 = vsub.f32 %v316_v56, %v323_v6 }
 0x27c   :  { %v329_v8 = vmul.f32 1.442695, %v327_v7 }
 0x27e   :  { %1768 = vpow2.f32 %v329_v8 }
 0x281   :  { %v326_v9 = vpop.xlane.xlu2 %325  ;;  %v185_v10 = vpop.xlane.xlu1 %184 }
 0x282   :  { %v328_v11 = vsub.f32 %v319_v62, %v326_v9  ;;  %v189_v12 = vsub.f32 %v177_v60, %v185_v10 }
 0x284   :  { %v1769_v13 = vpop.eup %1768  ;;  %v331_v14 = vmul.f32 1.442695, %v328_v11  ;;  %v191_v15 = vmul.f32 1.442695, %v189_v12 }
 0x285   :  { %v333_v16 = vsel %vm182_vm4, %v1769_v13, 0.0 }
 0x286   :  { %1770 = vpow2.f32 %v331_v14  ;;  %334 = vadd.xlane.f32.xlu0 %v333_v16 }
 0x287   :  { %1772 = vpow2.f32 %v191_v15  ;;  %v1744_v15 = vld [vmem:[%s2412_s6 + $0x2] ss:$0 sm:$0xff] }
 0x289   :  { %v188_v17 = vpop.xlane.xlu2 %187 }
 0x28a   :  { %v190_v18 = vsub.f32 %v180_v2, %v188_v17 }
 0x28c   :  { %v2038_v19 = vpop.eup %1770  ;;  %v193_v20 = vmul.f32 1.442695, %v190_v18 }
 0x28d   :  { %v2040_v21 = vpop.eup %1772  ;;  %v336_v22 = vsel %vm182_vm4, %v2038_v19, 0.0 }
 0x28e   :  { %1774 = vpow2.f32 %v193_v20  ;;  %337 = vadd.xlane.f32.xlu2 %v336_v22  ;;  %v195_v23 = vsel %vm182_vm4, %v2040_v21, 0.0 }
 0x28f   :  { %196 = vadd.xlane.f32.xlu1 %v195_v23 }
 0x294   :  { %v2046_v24 = vpop.eup %1774 }
 0x295   :  { %v198_v25 = vsel %vm182_vm4, %v2046_v24, 0.0 }
 0x297   :  { %199 = vadd.xlane.f32.xlu1 %v198_v25 }
 0x2f9   :  { %v335_v26 = vpop.xlane.xlu0 %334 }
 0x2fa   :  { %1776 = vrcp.f32 %v335_v26  ;;  %v350_v34 = vand.u32 2147483648, %v335_v26  ;;  %v348_v36 = vand.u32 2147483647, %v335_v26  ;;  %vm344_vm7 = vweird.f32 %v335_v26 }
 0x2fc   :  { %v351_v39 = vor.u32 1.1754944e-38, %v350_v34  ;;  %vm349_vm9 = vcmp.eq.f32.partialorder %v348_v36, 8.507059e+37 }
 0x300   :  { %v1777_v27 = vpop.eup %1776 }
 0x301   :  { %v340_v28 = vmul.f32 %v1777_v27, %v335_v26  ;;  %v338_v30 = vpop.xlane.xlu2 %337  ;;  %vm345_vm6 = vweird.f32 %v1777_v27 }
 0x302   :  { %1778 = vrcp.f32 %v338_v30  ;;  %v197_v32 = vpop.xlane.xlu1 %196  ;;  %vm346_vm8 = vmor %vm344_vm7, %vm345_vm6  ;;  %v365_v47 = vand.u32 2147483648, %v338_v30  ;;  %v363_v52 = vand.u32 2147483647, %v338_v30  ;;  %vm359_vm12 = vweird.f32 %v338_v30 }
 0x303   :  { %v341_v33 = vsub.f32 1.0, %v340_v28  ;;  %1780 = vrcp.f32 %v197_v32  ;;  %v212_v51 = vand.u32 2147483648, %v197_v32  ;;  %v210_v55 = vand.u32 2147483647, %v197_v32 }
 0x304   :  { %v366_v57 = vor.u32 1.1754944e-38, %v365_v47  ;;  %vm206_vm13 = vweird.f32 %v197_v32  ;;  %vm364_vm1 = vcmp.eq.f32.partialorder %v363_v52, 8.507059e+37 }
 0x305   :  { %v342_v35 = vmul.f32 %v1777_v27, %v341_v33  ;;  %v213_v61 = vor.u32 1.1754944e-38, %v212_v51  ;;  %vm211_vm2 = vcmp.eq.f32.partialorder %v210_v55, 8.507059e+37 }
 0x307   :  { %v343_v37 = vadd.f32 %v1777_v27, %v342_v35 }
 0x308   :  { %v1779_v38 = vpop.eup %1778 }
 0x309   :  { %v1781_v40 = vpop.eup %1780  ;;  %v347_v41 = vsel %vm346_vm8, %v1777_v27, %v343_v37  ;;  %v355_v42 = vmul.f32 %v1779_v38, %v338_v30  ;;  %vm360_vm10 = vweird.f32 %v1779_v38  ;;  %v1896_v27 = vmov 32.0  }
 0x30a   :  { %v352_v43 = vsel %vm349_vm9, %v351_v39, %v347_v41  ;;  %v202_v44 = vmul.f32 %v1781_v40, %v197_v32  ;;  %v200_v45 = vpop.xlane.xlu1 %199  ;;  %vm207_vm11 = vweird.f32 %v1781_v40  ;;  %vm361_vm14 = vmor %vm359_vm12, %vm360_vm10 }
 0x30b   :  { %v356_v46 = vsub.f32 1.0, %v355_v42  ;;  %1782 = vrcp.f32 %v200_v45  ;;  %v353_v49 = vmul.f32 %v1769_v13, %v352_v43  ;;  %vm208_vm15 = vmor %vm206_vm13, %vm207_vm11  ;;  %v227_v6 = vand.u32 2147483648, %v200_v45 }
 0x30c   :  { %v203_v48 = vsub.f32 1.0, %v202_v44  ;;  %v225_v8 = vand.u32 2147483647, %v200_v45  ;;  %vm221_vm5 = vweird.f32 %v200_v45  ;;  %1784 = vrcp.f32 %v1896_v27  ;;  %v590_v27 = vld [vmem:[%s2410_s4 + $0x8] sm:$0xff] }
 0x30d   :  { %v357_v50 = vmul.f32 %v1779_v38, %v356_v46  ;;  %1652 = vmatmul.msk.f32.vlgmr.msra.gmra.mxu3 %vm182_vm4, %v353_v49  ;;  %v228_v10 = vor.u32 1.1754944e-38, %v227_v6 }
 0x30e   :  { %v204_v54 = vmul.f32 %v1781_v40, %v203_v48  ;;  %vm226_vm7 = vcmp.eq.f32.partialorder %v225_v8, 8.507059e+37 }
 0x30f   :  { %v358_v56 = vadd.f32 %v1779_v38, %v357_v50 }
 0x310   :  { %v205_v58 = vadd.f32 %v1781_v40, %v204_v54 }
 0x311   :  { %v1783_v60 = vpop.eup %1782  ;;  %v362_v62 = vsel %vm361_vm14, %v1779_v38, %v358_v56 }
 0x312   :  { %v209_v63 = vsel %vm208_vm15, %v1781_v40, %v205_v58  ;;  %v217_v0 = vmul.f32 %v1783_v60, %v200_v45  ;;  %v367_v1 = vsel %vm364_vm1, %v366_v57, %v362_v62  ;;  %vm222_vm3 = vweird.f32 %v1783_v60  ;;  %v1785_v28 = vpop.eup %1784 }
 0x313   :  { %v214_v2 = vsel %vm211_vm2, %v213_v61, %v209_v63  ;;  %v368_v3 = vmul.f32 %v2038_v19, %v367_v1  ;;  %vm223_vm6 = vmor %vm221_vm5, %vm222_vm3  ;;  %v470_v30 = vmul.f32 32.0, %v1785_v28  ;;  %vm474_vm8 = vweird.f32 %v1785_v28 }
 0x314   :  { %v218_v4 = vsub.f32 1.0, %v217_v0  ;;  %v215_v5 = vmul.f32 %v2040_v21, %v214_v2  ;;  %v1746_v0 = vld [vmem:[%s2412_s6 + $0x6] ss:$0 sm:$0xff] }
 0x315   :  { %1653 = vmatmul.msk.f32.gmra.mxu3 %vm182_vm4, %v368_v3  ;;  %v471_v32 = vsub.f32 1.0, %v470_v30  ;;  %v1747_v3 = vld [vmem:[%s2412_s6 + $0x3] ss:$0 sm:$0xff] }
 0x316   :  { %v219_v7 = vmul.f32 %v1783_v60, %v218_v4  ;;  %1654 = vmatmul.msk.f32.vlgmr.msra.gmra.mxu0 %vm182_vm4, %v215_v5 }
 0x317   :  { %v472_v33 = vmul.f32 %v1785_v28, %v471_v32 }
 0x318   :  { %v220_v9 = vadd.f32 %v1783_v60, %v219_v7 }
 0x319   :  { %v473_v34 = vadd.f32 %v1785_v28, %v472_v33 }
 0x31a   :  { %v224_v11 = vsel %vm223_vm6, %v1783_v60, %v220_v9  ;;  %v1745_v60 = vld [vmem:[%s2412_s6 + $0x5] ss:$0 sm:$0xff] }
 0x31b   :  { %v229_v12 = vsel %vm226_vm7, %v228_v10, %v224_v11 }
 0x31c   :  { %v230_v13 = vmul.f32 %v2046_v24, %v229_v12 }
 0x31e   :  { %1655 = vmatmul.msk.f32.gmra.mxu0 %vm182_vm4, %v230_v13 }
 0x390   :  { %v415_v14 = vpop.f32.mrf.mxu3 }
 0x393   :  { %v444_v16 = vpop.f32.mrf.mxu0 }
 0x394   :  { %v445_v17 = vadd.f32 %v444_v16, %v415_v14 }
 0x396   :  { %v455_v18 = vadd.f32 %v1744_v15, %v445_v17 }
 0x398   :  { %v457_v19 = vadd.f32 %v455_v18, %v1987_v31  ;;  %v418_v21 = vpop.f32.mrf.mxu3  ;;  %v2064_v31 = vsel %vm474_vm8, %v1785_v28, %v473_v34  ;;  %v589_v28 = vld [vmem:[%s2410_s4] sm:$0xff] }
 0x39a   :  { %v463_v20 = vsel %vm71_vm0, %v457_v19, 0.0 }
 0x39b   :  { %464 = vadd.xlane.f32.xlu2 %v463_v20  ;;  %v447_v22 = vpop.f32.mrf.mxu0 }
 0x39c   :  { %v448_v23 = vadd.f32 %v447_v22, %v418_v21 }
 0x39e   :  { %v456_v25 = vadd.f32 %v1744_v15, %v448_v23 }
 0x3a0   :  { %v458_v24 = vadd.f32 %v456_v25, %v1985_v29 }
 0x3a2   :  { %v466_v26 = vsel %vm71_vm0, %v458_v24, 0.0 }
 0x3a3   :  { %467 = vadd.xlane.f32.xlu1 %v466_v26  ;;  %v591_v26 = vld [vmem:[%s2410_s4 + $0x10] sm:$0xff] }
 0x40e   :  { %v465_v35 = vpop.xlane.xlu2 %464 }
 0x40f   :  { %v476_v36 = vmul.f32 %v2064_v31, %v465_v35 }
 0x411   :  { %v478_v37 = vsub.f32 %v457_v19, %v476_v36 }
 0x413   :  { %v480_v38 = vmul.f32 %v478_v37, %v478_v37 }
 0x415   :  { %v482_v29 = vsel %vm71_vm0, %v480_v38, 0.0 }
 0x416   :  { %483 = vadd.xlane.f32.xlu2 %v482_v29  ;;  %v468_v39 = vpop.xlane.xlu1 %467 }
 0x417   :  { %v477_v40 = vmul.f32 %v2064_v31, %v468_v39 }
 0x419   :  { %v479_v41 = vsub.f32 %v458_v24, %v477_v40  ;;  %v592_v24 = vld [vmem:[%s2410_s4 + $0x18] sm:$0xff] }
 0x41a   :  { %615 = vmatpush.msra.mxu1 %v592_v24 }
 0x41b   :  { %v481_v42 = vmul.f32 %v479_v41, %v479_v41 }
 0x41c   :  { %616 = vmatpush.msra.mxu1 %v591_v26 }
 0x41d   :  { %v485_v43 = vsel %vm71_vm0, %v481_v42, 0.0 }
 0x41e   :  { %486 = vadd.xlane.f32.xlu1 %v485_v43  ;;  %617 = vmatpush.msra.mxu1 %v590_v27 }
 0x420   :  { %618 = vmatpush.msra.mxu1 %v589_v28  ;;  %v715_v28 = vld [vmem:[%s2411_s5 + $0x8] sm:$0xff] }
 0x489   :  { %v484_v44 = vpop.xlane.xlu2 %483 }
 0x48a   :  { %v488_v45 = vmul.f32 %v484_v44, %v2064_v31  ;;  %v1748_v44 = vld [vmem:[%s2412_s6 + $0x7] ss:$0 sm:$0xff] }
 0x48c   :  { %v490_v46 = vadd.f32 1e-05, %v488_v45 }
 0x48e   :  { %1786 = vrsqrt.f32 %v490_v46  ;;  %vm498_vm10 = vweird.f32 %v490_v46 }
 0x491   :  { %v487_v47 = vpop.xlane.xlu1 %486 }
 0x492   :  { %v489_v48 = vmul.f32 %v487_v47, %v2064_v31 }
 0x494   :  { %v1787_v49 = vpop.eup %1786  ;;  %v491_v50 = vadd.f32 1e-05, %v489_v48  ;;  %v1749_v48 = vld [vmem:[%s2412_s6 + $0x8] ss:$0 sm:$0xff] }
 0x495   :  { %v493_v51 = vmul.f32 %v1787_v49, %v490_v46  ;;  %vm499_vm9 = vweird.f32 %v1787_v49 }
 0x496   :  { %1788 = vrsqrt.f32 %v491_v50  ;;  %vm500_vm11 = vmor %vm498_vm10, %vm499_vm9  ;;  %vm508_vm13 = vweird.f32 %v491_v50 }
 0x497   :  { %v494_v52 = vmul.f32 %v1787_v49, %v493_v51 }
 0x499   :  { %v495_v54 = vmul.f32 0.5, %v494_v52 }
 0x49b   :  { %v496_v55 = vsub.f32 1.5, %v495_v54 }
 0x49c   :  { %v1789_v56 = vpop.eup %1788 }
 0x49d   :  { %v497_v57 = vmul.f32 %v1787_v49, %v496_v55  ;;  %v503_v58 = vmul.f32 %v1789_v56, %v491_v50  ;;  %vm509_vm12 = vweird.f32 %v1789_v56 }
 0x49e   :  { %vm510_vm14 = vmor %vm508_vm13, %vm509_vm12  ;;  %vm727_vm13 = vcmask 523264  }
 0x49f   :  { %v501_v61 = vsel %vm500_vm11, %v1787_v49, %v497_v57  ;;  %v504_v62 = vmul.f32 %v1789_v56, %v503_v58 }
 0x4a0   :  { %v512_v63 = vmul.f32 %v501_v61, %v478_v37 }
 0x4a1   :  { %v505_v1 = vmul.f32 0.5, %v504_v62 }
 0x4a2   :  { %v517_v2 = vmul.f32 %v1745_v60, %v512_v63 }
 0x4a3   :  { %v506_v4 = vsub.f32 1.5, %v505_v1 }
 0x4a4   :  { %v522_v5 = vadd.f32 %v1746_v0, %v517_v2 }
 0x4a5   :  { %v507_v6 = vmul.f32 %v1789_v56, %v506_v4 }
 0x4a6   :  { %v529_v7 = vadd.f32 %v1747_v3, %v522_v5 }
 0x4a7   :  { %v511_v8 = vsel %vm510_vm14, %v1789_v56, %v507_v6 }
 0x4a8   :  { %v535_v9 = vsel %vm71_vm0, %v529_v7, 0.0  ;;  %v513_v10 = vmul.f32 %v511_v8, %v479_v41 }
 0x4a9   :  { %536 = vadd.xlane.f32.xlu2 %v535_v9 }
 0x4aa   :  { %v518_v11 = vmul.f32 %v1745_v60, %v513_v10  ;;  %v1750_v60 = vld [vmem:[%s2413_s7] ss:$0 sm:$0xff] }
 0x4ac   :  { %v523_v12 = vadd.f32 %v1746_v0, %v518_v11  ;;  %v719_v11 = vld [vmem:[%s2411_s5 + $0x28] sm:$0xff] }
 0x4ae   :  { %v530_v13 = vadd.f32 %v1747_v3, %v523_v12  ;;  %v721_v3 = vld [vmem:[%s2411_s5 + $0x38] sm:$0xff] }
 0x4af   :  { %742 = vmatpush.msrb.mxu2 %v721_v3 }
 0x4b0   :  { %v538_v14 = vsel %vm71_vm0, %v530_v13, 0.0 }
 0x4b1   :  { %539 = vadd.xlane.f32.xlu1 %v538_v14 }
 0x51c   :  { %v537_v15 = vpop.xlane.xlu2 %536 }
 0x51d   :  { %v541_v16 = vmul.f32 %v537_v15, %v2064_v31  ;;  %v718_v15 = vld [vmem:[%s2411_s5 + $0x20] sm:$0xff] }
 0x51f   :  { %v543_v17 = vsub.f32 %v529_v7, %v541_v16  ;;  %v720_v7 = vld [vmem:[%s2411_s5 + $0x30] sm:$0xff] }
 0x520   :  { %743 = vmatpush.msrb.mxu2 %v720_v7 }
 0x521   :  { %v545_v18 = vmul.f32 %v543_v17, %v543_v17 }
 0x522   :  { %744 = vmatpush.msrb.mxu2 %v719_v11 }
 0x523   :  { %v547_v19 = vsel %vm71_vm0, %v545_v18, 0.0 }
 0x524   :  { %548 = vadd.xlane.f32.xlu2 %v547_v19  ;;  %v540_v20 = vpop.xlane.xlu1 %539  ;;  %745 = vmatpush.msrb.mxu2 %v718_v15  ;;  %v717_v19 = vld [vmem:[%s2411_s5 + $0x18] sm:$0xff] }
 0x525   :  { %v542_v21 = vmul.f32 %v540_v20, %v2064_v31 }
 0x526   :  { %746 = vmatpush.msrb.mxu2 %v717_v19 }
 0x527   :  { %v544_v22 = vsub.f32 %v530_v13, %v542_v21 }
 0x529   :  { %v546_v23 = vmul.f32 %v544_v22, %v544_v22 }
 0x52b   :  { %v550_v25 = vsel %vm71_vm0, %v546_v23, 0.0  ;;  %v716_v23 = vld [vmem:[%s2411_s5 + $0x10] sm:$0xff] }
 0x52c   :  { %551 = vadd.xlane.f32.xlu1 %v550_v25  ;;  %747 = vmatpush.msrb.mxu2 %v716_v23 }
 0x52e   :  { %748 = vmatpush.msrb.mxu2 %v715_v28 }
 0x597   :  { %v549_v30 = vpop.xlane.xlu2 %548 }
 0x598   :  { %v553_v32 = vmul.f32 %v549_v30, %v2064_v31 }
 0x59a   :  { %v555_v33 = vadd.f32 1e-05, %v553_v32 }
 0x59c   :  { %1790 = vrsqrt.f32 %v555_v33  ;;  %vm563_vm1 = vweird.f32 %v555_v33 }
 0x59f   :  { %v552_v34 = vpop.xlane.xlu1 %551 }
 0x5a0   :  { %v554_v35 = vmul.f32 %v552_v34, %v2064_v31  ;;  %v714_v34 = vld [vmem:[%s2411_s5] sm:$0xff] }
 0x5a1   :  { %749 = vmatpush.msrb.mxu2 %v714_v34 }
 0x5a2   :  { %v1791_v36 = vpop.eup %1790  ;;  %v556_v37 = vadd.f32 1e-05, %v554_v35 }
 0x5a3   :  { %v558_v38 = vmul.f32 %v1791_v36, %v555_v33  ;;  %vm564_vm15 = vweird.f32 %v1791_v36 }
 0x5a4   :  { %1792 = vrsqrt.f32 %v556_v37  ;;  %vm565_vm2 = vmor %vm563_vm1, %vm564_vm15  ;;  %vm573_vm5 = vweird.f32 %v556_v37 }
 0x5a5   :  { %v559_v29 = vmul.f32 %v1791_v36, %v558_v38 }
 0x5a7   :  { %v560_v39 = vmul.f32 0.5, %v559_v29 }
 0x5a9   :  { %v561_v40 = vsub.f32 1.5, %v560_v39 }
 0x5aa   :  { %v1793_v41 = vpop.eup %1792 }
 0x5ab   :  { %v562_v42 = vmul.f32 %v1791_v36, %v561_v40  ;;  %v568_v43 = vmul.f32 %v1793_v41, %v556_v37  ;;  %vm574_vm3 = vweird.f32 %v1793_v41 }
 0x5ac   :  { %vm575_vm6 = vmor %vm573_vm5, %vm574_vm3 }
 0x5ad   :  { %v566_v45 = vsel %vm565_vm2, %v1791_v36, %v562_v42  ;;  %v569_v46 = vmul.f32 %v1793_v41, %v568_v43 }
 0x5ae   :  { %v577_v47 = vmul.f32 %v566_v45, %v543_v17 }
 0x5af   :  { %v570_v49 = vmul.f32 0.5, %v569_v46 }
 0x5b0   :  { %v582_v50 = vmul.f32 %v1748_v44, %v577_v47 }
 0x5b1   :  { %v571_v51 = vsub.f32 1.5, %v570_v49 }
 0x5b2   :  { %v2107_v52 = vadd.f32 %v1749_v48, %v582_v50 }
 0x5b3   :  { %v572_v54 = vmul.f32 %v1793_v41, %v571_v51 }
 0x5b4   :  { %1662 = vmatmul.msk.f32.vlgmr.msra.gmra.mxu1 %vm71_vm0, %v2107_v52 }
 0x5b5   :  { %v576_v55 = vsel %vm575_vm6, %v1793_v41, %v572_v54 }
 0x5b6   :  { %v578_v56 = vmul.f32 %v576_v55, %v544_v22 }
 0x5b8   :  { %v583_v57 = vmul.f32 %v1748_v44, %v578_v56 }
 0x5ba   :  { %v2111_v58 = vadd.f32 %v1749_v48, %v583_v57 }
 0x5bc   :  { %1663 = vmatmul.msk.f32.gmra.mxu1 %vm71_vm0, %v2111_v58 }
 0x631   :  { %v620_v61 = vpop.f32.mrf.mxu1 }
 0x632   :  { %v2118_v62 = vadd.f32 %v1750_v60, %v620_v61 }
 0x634   :  { %v2121_v63 = vmul.f32 0.70710677, %v2118_v62 }
 0x636   :  { %v630_v0 = vmul.f32 %v2121_v63, %v2121_v63 }
 0x638   :  { %v631_v1 = vmin.f32 %v630_v0, 16.0 }
 0x639   :  { %v623_v2 = vpop.f32.mrf.mxu1 }
 0x63a   :  { %v632_v4 = vmul.f32 2.1237322e-06, %v631_v1  ;;  %v643_v5 = vmul.f32 3.8918573e-05, %v631_v1  ;;  %v2128_v6 = vadd.f32 %v1750_v60, %v623_v2 }
 0x63c   :  { %v633_v8 = vadd.f32 0.00028619796, %v632_v4  ;;  %v644_v9 = vadd.f32 0.001143296, %v643_v5  ;;  %v2134_v10 = vmul.f32 0.70710677, %v2128_v6 }
 0x63d   :  { %v627_v28 = vmul.f32 0.5, %v2128_v6 }
 0x63e   :  { %v634_v12 = vmul.f32 %v633_v8, %v631_v1  ;;  %v645_v13 = vmul.f32 %v644_v9, %v631_v1  ;;  %v670_v14 = vmul.f32 %v2134_v10, %v2134_v10 }
 0x640   :  { %v646_v16 = vadd.f32 0.014752088, %v645_v13  ;;  %v635_v17 = vadd.f32 0.0036580483, %v634_v12  ;;  %v671_v18 = vmin.f32 %v670_v14, 16.0 }
 0x642   :  { %v647_v20 = vmul.f32 %v646_v16, %v631_v1  ;;  %v672_v21 = vmul.f32 2.1237322e-06, %v671_v18  ;;  %v683_v22 = vmul.f32 3.8918573e-05, %v671_v18  ;;  %v636_v24 = vmul.f32 %v635_v17, %v631_v1 }
 0x644   :  { %v648_v25 = vadd.f32 0.112945676, %v647_v20  ;;  %v673_v26 = vadd.f32 0.00028619796, %v672_v21  ;;  %v684_v27 = vadd.f32 0.001143296, %v683_v22 }
 0x645   :  { %v637_v36 = vadd.f32 0.05243302, %v636_v24  ;;  %v626_v20 = vmul.f32 0.5, %v2118_v62 }
 0x646   :  { %v649_v30 = vmul.f32 %v648_v25, %v631_v1  ;;  %v674_v32 = vmul.f32 %v673_v26, %v671_v18  ;;  %v685_v33 = vmul.f32 %v684_v27, %v671_v18 }
 0x647   :  { %v638_v41 = vmul.f32 %v637_v36, %v631_v1 }
 0x648   :  { %v650_v35 = vadd.f32 0.4994258, %v649_v30  ;;  %v686_v37 = vadd.f32 0.014752088, %v685_v33  ;;  %v675_v29 = vadd.f32 0.0036580483, %v674_v32 }
 0x649   :  { %v639_v45 = vadd.f32 0.18741608, %v638_v41  ;;  %v1751_v32 = vld [vmem:[%s2412_s6 + $0x4] ss:$0 sm:$0xff] }
 0x64a   :  { %v651_v38 = vmul.f32 %v650_v35, %v631_v1  ;;  %v687_v39 = vmul.f32 %v686_v37, %v671_v18  ;;  %v676_v43 = vmul.f32 %v675_v29, %v671_v18 }
 0x64b   :  { %v640_v50 = vmul.f32 %v639_v45, %v631_v1 }
 0x64c   :  { %v652_v40 = vadd.f32 1.0, %v651_v38  ;;  %v688_v42 = vadd.f32 0.112945676, %v687_v39  ;;  %v677_v47 = vadd.f32 0.05243302, %v676_v43 }
 0x64d   :  { %v641_v60 = vadd.f32 1.1283791, %v640_v50  ;;  %v964_v50 = vld [vmem:[#allocation2 + $0xd0] sm:$0xff] }
 0x64e   :  { %1794 = vrcp.f32 %v652_v40  ;;  %v689_v44 = vmul.f32 %v688_v42, %v671_v18  ;;  %v678_v55 = vmul.f32 %v677_v47, %v671_v18  ;;  %v664_v57 = vand.u32 2147483648, %v652_v40  ;;  %v965_v47 = vld [vmem:[#allocation2 + $0xd8] sm:$0xff] }
 0x64f   :  { %v662_v0 = vand.u32 2147483647, %v652_v40  ;;  %vm658_vm8 = vweird.f32 %v652_v40  ;;  %v642_v7 = vmul.f32 %v641_v60, %v2121_v63  ;;  %988 = vmatpush.msra.mxu2 %v965_v47  ;;  %v962_v60 = vld [vmem:[#allocation2 + $0xc0] sm:$0xff] }
 0x650   :  { %v690_v46 = vadd.f32 0.4994258, %v689_v44  ;;  %v679_v2 = vadd.f32 0.18741608, %v678_v55  ;;  %v665_v4 = vor.u32 1.1754944e-38, %v664_v57  ;;  %v963_v55 = vld [vmem:[#allocation2 + $0xc8] sm:$0xff] }
 0x651   :  { %vm663_vm10 = vcmp.eq.f32.partialorder %v662_v0, 8.507059e+37  ;;  %989 = vmatpush.msra.mxu2 %v964_v50  ;;  %v818_v57 = vld [vmem:[#allocation2 + $0x80] sm:$0xff] }
 0x652   :  { %v691_v48 = vmul.f32 %v690_v46, %v671_v18  ;;  %v680_v9 = vmul.f32 %v679_v2, %v671_v18  ;;  %v821_v46 = vld [vmem:[#allocation2 + $0x98] sm:$0xff] }
 0x653   :  { %850 = vmatpush.msrb.mxu3 %v821_v46  ;;  %990 = vmatpush.msra.mxu2 %v963_v55 }
 0x654   :  { %v1795_v49 = vpop.eup %1794  ;;  %v692_v54 = vadd.f32 1.0, %v691_v48  ;;  %v681_v16 = vadd.f32 1.1283791, %v680_v9  ;;  %v826_v48 = vld [vmem:[#allocation2 + $0xb8] sm:$0xff] }
 0x655   :  { %v654_v51 = vmul.f32 %v1795_v49, %v652_v40  ;;  %vm659_vm7 = vweird.f32 %v1795_v49  ;;  %950 = vmatpush.msrb.mxu1 %v826_v48  ;;  %991 = vmatpush.msra.mxu2 %v962_v60 }
 0x656   :  { %1796 = vrcp.f32 %v692_v54  ;;  %vm660_vm9 = vmor %vm658_vm8, %vm659_vm7  ;;  %v704_v15 = vand.u32 2147483648, %v692_v54  ;;  %v702_v19 = vand.u32 2147483647, %v692_v54  ;;  %vm698_vm12 = vweird.f32 %v692_v54 }
 0x657   :  { %v655_v56 = vsub.f32 1.0, %v654_v51  ;;  %v682_v18 = vmul.f32 %v681_v16, %v2134_v10  ;;  %v825_v51 = vld [vmem:[#allocation2 + $0xb0] sm:$0xff] }
 0x658   :  { %v705_v23 = vor.u32 1.1754944e-38, %v704_v15  ;;  %vm703_vm15 = vcmp.eq.f32.partialorder %v702_v19, 8.507059e+37  ;;  %951 = vmatpush.msrb.mxu1 %v825_v51  ;;  %v1752_v15 = vld [vmem:[%s2412_s6 + $0x9] ss:$0 sm:$0xff]  ;;  %v1753_v19 = vld [vmem:[%s2412_s6 + $0xa] ss:$0 sm:$0xff] }
 0x659   :  { %v656_v61 = vmul.f32 %v1795_v49, %v655_v56  ;;  %v824_v56 = vld [vmem:[#allocation2 + $0xa8] sm:$0xff] }
 0x65a   :  { %952 = vmatpush.msrb.mxu1 %v824_v56 }
 0x65b   :  { %v657_v3 = vadd.f32 %v1795_v49, %v656_v61  ;;  %v823_v61 = vld [vmem:[#allocation2 + $0xa0] sm:$0xff] }
 0x65c   :  { %v1797_v5 = vpop.eup %1796  ;;  %953 = vmatpush.msrb.mxu1 %v823_v61 }
 0x65d   :  { %v661_v8 = vsel %vm660_vm9, %v1795_v49, %v657_v3  ;;  %v694_v11 = vmul.f32 %v1797_v5, %v692_v54  ;;  %vm699_vm11 = vweird.f32 %v1797_v5  ;;  %v820_v49 = vld [vmem:[#allocation2 + $0x90] sm:$0xff]  ;;  %v819_v54 = vld [vmem:[#allocation2 + $0x88] sm:$0xff] }
 0x65e   :  { %v666_v1 = vsel %vm663_vm10, %v665_v4, %v661_v8  ;;  %vm700_vm14 = vmor %vm698_vm12, %vm699_vm11  ;;  %851 = vmatpush.msrb.mxu3 %v820_v49 }
 0x65f   :  { %v667_v12 = vmul.f32 %v666_v1, %v642_v7  ;;  %v695_v13 = vsub.f32 1.0, %v694_v11 }
 0x660   :  { %852 = vmatpush.msrb.mxu3 %v819_v54 }
 0x661   :  { %v1664_v14 = vclamps-f32 %v667_v12, 1.0  ;;  %v696_v17 = vmul.f32 %v1797_v5, %v695_v13 }
 0x662   :  { %853 = vmatpush.msrb.mxu3 %v818_v57 }
 0x663   :  { %v710_v21 = vadd.f32 1.0, %v1664_v14  ;;  %v697_v22 = vadd.f32 %v1797_v5, %v696_v17 }
 0x665   :  { %v712_v63 = vmul.f32 %v710_v21, %v626_v20  ;;  %v701_v25 = vsel %vm700_vm14, %v1797_v5, %v697_v22 }
 0x666   :  { %v706_v24 = vsel %vm703_vm15, %v705_v23, %v701_v25 }
 0x667   :  { %1667 = vmatmul.msk.f32.vlgmr.msrb.gmra.mxu2 %vm727_vm13, %v712_v63  ;;  %v707_v26 = vmul.f32 %v706_v24, %v682_v18 }
 0x669   :  { %v1665_v27 = vclamps-f32 %v707_v26, 1.0 }
 0x66b   :  { %v711_v30 = vadd.f32 1.0, %v1665_v27 }
 0x66d   :  { %v713_v62 = vmul.f32 %v711_v30, %v627_v28  ;;  %v970_v30 = vld [vmem:[#allocation2 + $0xf8] sm:$0xff] }
 0x66f   :  { %1668 = vmatmul.msk.f32.gmra.mxu2 %vm727_vm13, %v713_v62  ;;  %v969_v62 = vld [vmem:[#allocation2 + $0xf0] sm:$0xff] }
 0x6ea   :  { %v751_v33 = vpop.f32.mrf.mxu2 }
 0x6eb   :  { %v752_v34 = vadd.f32 %v1751_v32, %v751_v33  ;;  %v967_v33 = vld [vmem:[#allocation2 + $0xe0] sm:$0xff] }
 0x6ed   :  { %v757_v10 = vadd.f32 %v752_v34, %v2107_v52 }
 0x6ef   :  { %v763_v35 = vsel %vm71_vm0, %v757_v10, 0.0 }
 0x6f0   :  { %764 = vadd.xlane.f32.xlu2 %v763_v35  ;;  %v1755_v35 = vld [vmem:[%s2412_s6 + $0xc] ss:$0 sm:$0xff] }
 0x6f2   :  { %v754_v36 = vpop.f32.mrf.mxu2 }
 0x6f3   :  { %v755_v37 = vadd.f32 %v1751_v32, %v754_v36  ;;  %v968_v32 = vld [vmem:[#allocation2 + $0xe8] sm:$0xff] }
 0x6f5   :  { %v758_v38 = vadd.f32 %v755_v37, %v2111_v58 }
 0x6f7   :  { %v766_v6 = vsel %vm71_vm0, %v758_v38, 0.0 }
 0x6f8   :  { %767 = vadd.xlane.f32.xlu0 %v766_v6 }
 0x763   :  { %v765_v29 = vpop.xlane.xlu2 %764 }
 0x764   :  { %v769_v39 = vmul.f32 %v765_v29, %v2064_v31 }
 0x766   :  { %v771_v40 = vsub.f32 %v757_v10, %v769_v39  ;;  %v1754_v10 = vld [vmem:[%s2412_s6 + $0xb] ss:$0 sm:$0xff] }
 0x768   :  { %v773_v41 = vmul.f32 %v771_v40, %v771_v40 }
 0x76a   :  { %v775_v42 = vsel %vm71_vm0, %v773_v41, 0.0 }
 0x76b   :  { %776 = vadd.xlane.f32.xlu1 %v775_v42  ;;  %v768_v43 = vpop.xlane.xlu0 %767 }
 0x76c   :  { %v770_v52 = vmul.f32 %v768_v43, %v2064_v31 }
 0x76e   :  { %v2172_v44 = vsub.f32 %v758_v38, %v770_v52 }
 0x770   :  { %v774_v45 = vmul.f32 %v2172_v44, %v2172_v44 }
 0x772   :  { %v778_v58 = vsel %vm71_vm0, %v774_v45, 0.0 }
 0x773   :  { %779 = vadd.xlane.f32.xlu2 %v778_v58 }
 0x7de   :  { %v777_v0 = vpop.xlane.xlu1 %776 }
 0x7df   :  { %v781_v2 = vmul.f32 %v777_v0, %v2064_v31 }
 0x7e1   :  { %v783_v3 = vadd.f32 1e-05, %v781_v2 }
 0x7e3   :  { %1798 = vrsqrt.f32 %v783_v3  ;;  %vm791_vm2 = vweird.f32 %v783_v3 }
 0x7e6   :  { %v780_v4 = vpop.xlane.xlu2 %779 }
 0x7e7   :  { %v782_v5 = vmul.f32 %v780_v4, %v2064_v31 }
 0x7e9   :  { %v1799_v7 = vpop.eup %1798  ;;  %v784_v1 = vadd.f32 1e-05, %v782_v5 }
 0x7ea   :  { %v786_v8 = vmul.f32 %v1799_v7, %v783_v3  ;;  %vm792_vm1 = vweird.f32 %v1799_v7 }
 0x7eb   :  { %1800 = vrsqrt.f32 %v784_v1  ;;  %vm793_vm3 = vmor %vm791_vm2, %vm792_vm1  ;;  %vm801_vm6 = vweird.f32 %v784_v1 }
 0x7ec   :  { %v787_v9 = vmul.f32 %v1799_v7, %v786_v8 }
 0x7ee   :  { %v788_v11 = vmul.f32 0.5, %v787_v9 }
 0x7f0   :  { %v789_v12 = vsub.f32 1.5, %v788_v11 }
 0x7f1   :  { %v1801_v13 = vpop.eup %1800 }
 0x7f2   :  { %v790_v14 = vmul.f32 %v1799_v7, %v789_v12  ;;  %v796_v16 = vmul.f32 %v1801_v13, %v784_v1  ;;  %vm802_vm5 = vweird.f32 %v1801_v13 }
 0x7f3   :  { %vm803_vm7 = vmor %vm801_vm6, %vm802_vm5 }
 0x7f4   :  { %v794_v17 = vsel %vm793_vm3, %v1799_v7, %v790_v14  ;;  %v797_v21 = vmul.f32 %v1801_v13, %v796_v16 }
 0x7f5   :  { %v805_v20 = vmul.f32 %v794_v17, %v771_v40 }
 0x7f6   :  { %v798_v63 = vmul.f32 0.5, %v797_v21 }
 0x7f7   :  { %v810_v22 = vmul.f32 %v1752_v15, %v805_v20 }
 0x7f8   :  { %v799_v18 = vsub.f32 1.5, %v798_v63 }
 0x7f9   :  { %v2185_v23 = vadd.f32 %v1753_v19, %v810_v22 }
 0x7fa   :  { %v800_v25 = vmul.f32 %v1801_v13, %v799_v18 }
 0x7fb   :  { %1672 = vmatmul.msk.f32.vlgmr.msrb.gmra.mxu3 %vm71_vm0, %v2185_v23  ;;  %1678 = vmatmul.msk.f32.vlgmr.msrb.gmra.mxu1 %vm71_vm0, %v2185_v23 }
 0x7fc   :  { %1681 = vmatmul.msk.f32.vlgmr.msra.gmra.mxu2 %vm71_vm0, %v2185_v23  ;;  %v804_v24 = vsel %vm803_vm7, %v1801_v13, %v800_v25 }
 0x7fd   :  { %v806_v26 = vmul.f32 %v804_v24, %v2172_v44 }
 0x7ff   :  { %v811_v27 = vmul.f32 %v1752_v15, %v806_v26 }
 0x801   :  { %v2194_v28 = vadd.f32 %v1753_v19, %v811_v27 }
 0x803   :  { %1673 = vmatmul.msk.f32.gmra.mxu3 %vm71_vm0, %v2194_v28  ;;  %1674 = vmatpush.xpose.msk.msrb.mxu0 %vm71_vm0, %v2194_v28 }
 0x804   :  { %1679 = vmatmul.msk.f32.gmra.mxu1 %vm71_vm0, %v2194_v28  ;;  %1682 = vmatmul.msk.f32.gmra.mxu2 %vm71_vm0, %v2194_v28 }
 0x805   :  { %1683 = vmatpush.xpose.msk.msra.mxu3 %vm71_vm0, %v2194_v28 }
 0x807   :  { %1675 = vmatpush.xpose.msk.msrb.mxu0 %vm71_vm0, %v2185_v23 }
 0x809   :  { %1684 = vmatpush.xpose.msk.msra.mxu3 %vm71_vm0, %v2185_v23 }
 0x80b   :  { %1088 = vmatpush.msra.mxu0 %v970_v30 }
 0x80d   :  { %1089 = vmatpush.msra.mxu0 %v969_v62 }
 0x80f   :  { %1090 = vmatpush.msra.mxu0 %v968_v32 }
 0x811   :  { %1091 = vmatpush.msra.mxu0 %v967_v33 }
 0x878   :  { %v955_v34 = vpop.f32.mrf.mxu1 }
 0x87e   :  { %v855_v36 = vpop.f32.mrf.mxu3 }
 0x87f   :  { %v856_v37 = vadd.f32 %v1754_v10, %v855_v36  ;;  %v993_v38 = vpop.f32.mrf.mxu2 }
 0x880   :  { %v994_v6 = vadd.f32 %v1755_v35, %v993_v38 }
 0x881   :  { %1676 = vmatmul.msk.f32.vlgmr.msrb.gmra.mxu0 %vm71_vm0, %v856_v37  ;;  %v958_v29 = vpop.f32.mrf.mxu1 }
 0x882   :  { %1685 = vmatmul.msk.f32.vlgmr.msra.gmra.mxu3 %vm71_vm0, %v994_v6  ;;  %1148 = vmatpush.msrb.mxu2 %v958_v29 }
 0x884   :  { %1149 = vmatpush.msrb.mxu2 %v955_v34 }
 0x886   :  { %v858_v39 = vpop.f32.mrf.mxu3 }
 0x887   :  { %v859_v40 = vadd.f32 %v1754_v10, %v858_v39  ;;  %v996_v41 = vpop.f32.mrf.mxu2 }
 0x888   :  { %v997_v42 = vadd.f32 %v1755_v35, %v996_v41 }
 0x889   :  { %1677 = vmatmul.msk.f32.gmra.mxu0 %vm71_vm0, %v859_v40 }
 0x88a   :  { %1686 = vmatmul.msk.f32.gmra.mxu3 %vm71_vm0, %v997_v42 }
 0x891   :  { %1687 = vmatmul.msk.f32.vlgmr.msra.gmra.mxu0 %vm71_vm0, %v2185_v23 }
 0x899   :  { %1688 = vmatmul.msk.f32.gmra.mxu0 %vm71_vm0, %v2194_v28 }
 0x8fe   :  { %v884_v43 = vpop.f32.mrf.mxu0 }
 0x8ff   :  { %v885_v52 = vadd.f32 %v884_v43, %v2025_v53 }
 0x901   :  { %v890_v44 = vsel %vm182_vm4, %v885_v52, -inf }
 0x902   :  { %891 = vmax.xlane.f32.xlu0 %v890_v44 }
 0x905   :  { %v1022_v45 = vpop.f32.mrf.mxu3 }
 0x906   :  { %v1023_v58 = vadd.f32 %v1022_v45, %v2025_v53  ;;  %v887_v46 = vpop.f32.mrf.mxu0 }
 0x907   :  { %v888_v47 = vadd.f32 %v887_v46, %v2029_v59 }
 0x908   :  { %v1028_v48 = vsel %vm182_vm4, %v1023_v58, -inf }
 0x909   :  { %1029 = vmax.xlane.f32.xlu1 %v1028_v48  ;;  %v893_v49 = vsel %vm182_vm4, %v888_v47, -inf }
 0x90a   :  { %894 = vmax.xlane.f32.xlu2 %v893_v49 }
 0x90d   :  { %v1025_v50 = vpop.f32.mrf.mxu3 }
 0x90e   :  { %v1026_v51 = vadd.f32 %v1025_v50, %v2029_v59  ;;  %v1093_v54 = vpop.f32.mrf.mxu0 }
 0x910   :  { %v1031_v55 = vsel %vm182_vm4, %v1026_v51, -inf }
 0x911   :  { %1032 = vmax.xlane.f32.xlu0 %v1031_v55 }
 0x916   :  { %v1096_v56 = vpop.f32.mrf.mxu0 }
 0x917   :  { %1119 = vmatpush.msra.mxu1 %v1096_v56 }
 0x919   :  { %1120 = vmatpush.msra.mxu1 %v1093_v54 }
 0x975   :  { %v892_v53 = vpop.xlane.xlu0 %891 }
 0x976   :  { %v896_v57 = vsub.f32 %v885_v52, %v892_v53 }
 0x978   :  { %v898_v60 = vmul.f32 1.442695, %v896_v57 }
 0x97a   :  { %1802 = vpow2.f32 %v898_v60 }
 0x97c   :  { %v1030_v61 = vpop.xlane.xlu1 %1029 }
 0x97d   :  { %v1034_v0 = vsub.f32 %v1023_v58, %v1030_v61  ;;  %v895_v2 = vpop.xlane.xlu2 %894 }
 0x97e   :  { %v897_v4 = vsub.f32 %v888_v47, %v895_v2 }
 0x97f   :  { %v1036_v3 = vmul.f32 1.442695, %v1034_v0 }
 0x980   :  { %v1803_v5 = vpop.eup %1802  ;;  %v900_v7 = vmul.f32 1.442695, %v897_v4 }
 0x981   :  { %1804 = vpow2.f32 %v1036_v3  ;;  %v902_v59 = vsel %vm182_vm4, %v1803_v5, 0.0 }
 0x982   :  { %903 = vadd.xlane.f32.xlu1 %v902_v59  ;;  %1806 = vpow2.f32 %v900_v7 }
 0x984   :  { %v1033_v8 = vpop.xlane.xlu0 %1032 }
 0x985   :  { %v1035_v1 = vsub.f32 %v1026_v51, %v1033_v8 }
 0x987   :  { %v1805_v9 = vpop.eup %1804  ;;  %v1038_v11 = vmul.f32 1.442695, %v1035_v1 }
 0x988   :  { %v1040_v12 = vsel %vm182_vm4, %v1805_v9, 0.0  ;;  %v2234_v13 = vpop.eup %1806 }
 0x989   :  { %1041 = vadd.xlane.f32.xlu2 %v1040_v12  ;;  %1808 = vpow2.f32 %v1038_v11  ;;  %v905_v14 = vsel %vm182_vm4, %v2234_v13, 0.0 }
 0x98a   :  { %906 = vadd.xlane.f32.xlu0 %v905_v14 }
 0x98f   :  { %v2238_v15 = vpop.eup %1808 }
 0x990   :  { %v1043_v16 = vsel %vm182_vm4, %v2238_v15, 0.0 }
 0x991   :  { %1044 = vadd.xlane.f32.xlu1 %v1043_v16 }
 0x9f5   :  { %v904_v17 = vpop.xlane.xlu1 %903 }
 0x9f6   :  { %1810 = vrcp.f32 %v904_v17  ;;  %v919_v18 = vand.u32 2147483648, %v904_v17  ;;  %v917_v24 = vand.u32 2147483647, %v904_v17  ;;  %vm913_vm9 = vweird.f32 %v904_v17 }
 0x9f8   :  { %v920_v30 = vor.u32 1.1754944e-38, %v919_v18  ;;  %vm918_vm11 = vcmp.eq.f32.partialorder %v917_v24, 8.507059e+37 }
 0x9fc   :  { %v1811_v19 = vpop.eup %1810  ;;  %v1042_v20 = vpop.xlane.xlu2 %1041 }
 0x9fd   :  { %v909_v21 = vmul.f32 %v1811_v19, %v904_v17  ;;  %1812 = vrcp.f32 %v1042_v20  ;;  %v907_v22 = vpop.xlane.xlu0 %906  ;;  %vm914_vm8 = vweird.f32 %v1811_v19  ;;  %v1057_v37 = vand.u32 2147483648, %v1042_v20 }
 0x9fe   :  { %1814 = vrcp.f32 %v907_v22  ;;  %vm915_vm10 = vmor %vm913_vm9, %vm914_vm8  ;;  %v1055_v29 = vand.u32 2147483647, %v1042_v20  ;;  %vm1051_vm14 = vweird.f32 %v1042_v20  ;;  %v934_v40 = vand.u32 2147483648, %v907_v22 }
 0x9ff   :  { %v910_v63 = vsub.f32 1.0, %v909_v21  ;;  %v932_v43 = vand.u32 2147483647, %v907_v22  ;;  %v1058_v52 = vor.u32 1.1754944e-38, %v1057_v37  ;;  %vm928_vm3 = vweird.f32 %v907_v22 }
 0xa00   :  { %vm1056_vm2 = vcmp.eq.f32.partialorder %v1055_v29, 8.507059e+37  ;;  %v935_v47 = vor.u32 1.1754944e-38, %v934_v40  ;;  %v1757_v29 = vld [vmem:[%s2412_s6 + $0x10] ss:$0 sm:$0xff] }
 0xa01   :  { %v911_v25 = vmul.f32 %v1811_v19, %v910_v63  ;;  %vm933_vm6 = vcmp.eq.f32.partialorder %v932_v43, 8.507059e+37 }
 0xa03   :  { %v1813_v26 = vpop.eup %1812  ;;  %v912_v27 = vadd.f32 %v1811_v19, %v911_v25 }
 0xa04   :  { %v1047_v62 = vmul.f32 %v1813_v26, %v1042_v20  ;;  %v1815_v32 = vpop.eup %1814  ;;  %v1045_v34 = vpop.xlane.xlu1 %1044  ;;  %vm1052_vm12 = vweird.f32 %v1813_v26 }
 0xa05   :  { %v916_v33 = vsel %vm915_vm10, %v1811_v19, %v912_v27  ;;  %v924_v36 = vmul.f32 %v1815_v32, %v907_v22  ;;  %1816 = vrcp.f32 %v1045_v34  ;;  %vm929_vm15 = vweird.f32 %v1815_v32  ;;  %vm1053_vm1 = vmor %vm1051_vm14, %vm1052_vm12 }
 0xa06   :  { %v921_v10 = vsel %vm918_vm11, %v920_v30, %v916_v33  ;;  %v1048_v35 = vsub.f32 1.0, %v1047_v62  ;;  %vm930_vm5 = vmor %vm928_vm3, %vm929_vm15  ;;  %v1072_v55 = vand.u32 2147483648, %v1045_v34  ;;  %v1070_v57 = vand.u32 2147483647, %v1045_v34 }
 0xa07   :  { %v922_v38 = vmul.f32 %v1803_v5, %v921_v10  ;;  %v925_v39 = vsub.f32 1.0, %v924_v36  ;;  %vm1066_vm8 = vweird.f32 %v1045_v34  ;;  %v1756_v5 = vld [vmem:[%s2412_s6 + $0xd] ss:$0 sm:$0xff] }
 0xa08   :  { %v1049_v6 = vmul.f32 %v1813_v26, %v1048_v35  ;;  %v1073_v61 = vor.u32 1.1754944e-38, %v1072_v55  ;;  %vm1071_vm10 = vcmp.eq.f32.partialorder %v1070_v57, 8.507059e+37 }
 0xa09   :  { %1691 = vmatmul.msk.f32.vlgmr.msrb.gmra.mxu2 %vm182_vm4, %v922_v38  ;;  %v926_v42 = vmul.f32 %v1815_v32, %v925_v39 }
 0xa0a   :  { %v1050_v41 = vadd.f32 %v1813_v26, %v1049_v6 }
 0xa0b   :  { %v1817_v44 = vpop.eup %1816  ;;  %v927_v58 = vadd.f32 %v1815_v32, %v926_v42  ;;  %v1758_v42 = vld [vmem:[%s2412_s6 + $0x11] ss:$0 sm:$0xff] }
 0xa0c   :  { %v1054_v45 = vsel %vm1053_vm1, %v1813_v26, %v1050_v41  ;;  %v1062_v48 = vmul.f32 %v1817_v44, %v1045_v34  ;;  %vm1067_vm7 = vweird.f32 %v1817_v44 }
 0xa0d   :  { %v1059_v46 = vsel %vm1056_vm2, %v1058_v52, %v1054_v45  ;;  %v931_v50 = vsel %vm930_vm5, %v1815_v32, %v927_v58  ;;  %vm1068_vm9 = vmor %vm1066_vm8, %vm1067_vm7 }
 0xa0e   :  { %v1060_v49 = vmul.f32 %v1805_v9, %v1059_v46  ;;  %v1063_v51 = vsub.f32 1.0, %v1062_v48  ;;  %v936_v54 = vsel %vm933_vm6, %v935_v47, %v931_v50 }
 0xa0f   :  { %v937_v56 = vmul.f32 %v2234_v13, %v936_v54 }
 0xa10   :  { %1689 = vmatmul.msk.f32.vlgmr.msra.gmra.mxu1 %vm182_vm4, %v1060_v49  ;;  %v1064_v53 = vmul.f32 %v1817_v44, %v1063_v51 }
 0xa11   :  { %1692 = vmatmul.msk.f32.gmra.mxu2 %vm182_vm4, %v937_v56 }
 0xa12   :  { %v1065_v60 = vadd.f32 %v1817_v44, %v1064_v53 }
 0xa14   :  { %v1069_v0 = vsel %vm1068_vm9, %v1817_v44, %v1065_v60  ;;  %v1759_v44 = vld [vmem:[%s2412_s6 + $0xe] ss:$0 sm:$0xff] }
 0xa15   :  { %v1074_v2 = vsel %vm1071_vm10, %v1073_v61, %v1069_v0 }
 0xa16   :  { %v1075_v3 = vmul.f32 %v2238_v15, %v1074_v2 }
 0xa18   :  { %1690 = vmatmul.msk.f32.gmra.mxu1 %vm182_vm4, %v1075_v3 }
 0xa8c   :  { %v1151_v4 = vpop.f32.mrf.mxu2 }
 0xa8d   :  { %v1122_v7 = vpop.f32.mrf.mxu1 }
 0xa8e   :  { %v1152_v59 = vadd.f32 %v1151_v4, %v1122_v7 }
 0xa90   :  { %v1162_v8 = vadd.f32 %v1756_v5, %v1152_v59  ;;  %v1702_v59 = vld [vmem:[%s2410_s4 + $0x38] sm:$0xff] }
 0xa91   :  { %1317 = vmatpush.msrb.mxu3 %v1702_v59 }
 0xa92   :  { %v1164_v1 = vadd.f32 %v1162_v8, %v2185_v23  ;;  %v1701_v8 = vld [vmem:[%s2410_s4 + $0x30] sm:$0xff] }
 0xa93   :  { %1318 = vmatpush.msrb.mxu3 %v1701_v8 }
 0xa94   :  { %v1170_v9 = vsel %vm71_vm0, %v1164_v1, 0.0  ;;  %v1154_v11 = vpop.f32.mrf.mxu2 }
 0xa95   :  { %1171 = vadd.xlane.f32.xlu2 %v1170_v9  ;;  %v1125_v12 = vpop.f32.mrf.mxu1  ;;  %v1699_v9 = vld [vmem:[%s2410_s4 + $0x20] sm:$0xff] }
 0xa96   :  { %v1155_v13 = vadd.f32 %v1154_v11, %v1125_v12 }
 0xa98   :  { %v1163_v14 = vadd.f32 %v1756_v5, %v1155_v13 }
 0xa9a   :  { %v1165_v15 = vadd.f32 %v1163_v14, %v2194_v28 }
 0xa9c   :  { %v1173_v16 = vsel %vm71_vm0, %v1165_v15, 0.0 }
 0xa9d   :  { %1174 = vadd.xlane.f32.xlu0 %v1173_v16 }
 0xb08   :  { %v1172_v17 = vpop.xlane.xlu2 %1171 }
 0xb09   :  { %v1176_v19 = vmul.f32 %v1172_v17, %v2064_v31 }
 0xb0b   :  { %v1178_v20 = vsub.f32 %v1164_v1, %v1176_v19  ;;  %v1700_v1 = vld [vmem:[%s2410_s4 + $0x28] sm:$0xff] }
 0xb0c   :  { %1319 = vmatpush.msrb.mxu3 %v1700_v1  ;;  %v1709_v1 = vld [vmem:[%s2411_s5 + $0x48] sm:$0xff] }
 0xb0d   :  { %v1180_v21 = vmul.f32 %v1178_v20, %v1178_v20 }
 0xb0e   :  { %1320 = vmatpush.msrb.mxu3 %v1699_v9 }
 0xb0f   :  { %v1182_v22 = vsel %vm71_vm0, %v1180_v21, 0.0 }
 0xb10   :  { %1183 = vadd.xlane.f32.xlu1 %v1182_v22  ;;  %v1175_v23 = vpop.xlane.xlu0 %1174 }
 0xb11   :  { %v1177_v63 = vmul.f32 %v1175_v23, %v2064_v31 }
 0xb13   :  { %v1179_v18 = vsub.f32 %v1165_v15, %v1177_v63 }
 0xb15   :  { %v1181_v25 = vmul.f32 %v1179_v18, %v1179_v18 }
 0xb17   :  { %v1185_v24 = vsel %vm71_vm0, %v1181_v25, 0.0 }
 0xb18   :  { %1186 = vadd.xlane.f32.xlu2 %v1185_v24 }
 0xb83   :  { %v1184_v28 = vpop.xlane.xlu1 %1183 }
 0xb84   :  { %v1188_v26 = vmul.f32 %v1184_v28, %v2064_v31 }
 0xb86   :  { %v1190_v27 = vadd.f32 1e-05, %v1188_v26 }
 0xb88   :  { %1818 = vrsqrt.f32 %v1190_v27  ;;  %vm1198_vm11 = vweird.f32 %v1190_v27 }
 0xb8b   :  { %v1187_v30 = vpop.xlane.xlu2 %1186 }
 0xb8c   :  { %v1189_v62 = vmul.f32 %v1187_v30, %v2064_v31 }
 0xb8e   :  { %v1819_v32 = vpop.eup %1818  ;;  %v1191_v34 = vadd.f32 1e-05, %v1189_v62 }
 0xb8f   :  { %v1193_v33 = vmul.f32 %v1819_v32, %v1190_v27  ;;  %vm1199_vm4 = vweird.f32 %v1819_v32  ;;  %v1761_v27 = vld [vmem:[%s2412_s6 + $0x13] ss:$0 sm:$0xff] }
 0xb90   :  { %1820 = vrsqrt.f32 %v1191_v34  ;;  %vm1200_vm12 = vmor %vm1198_vm11, %vm1199_vm4  ;;  %vm1208_vm15 = vweird.f32 %v1191_v34 }
 0xb91   :  { %v1194_v10 = vmul.f32 %v1819_v32, %v1193_v33 }
 0xb93   :  { %v1195_v35 = vmul.f32 0.5, %v1194_v10 }
 0xb95   :  { %v1196_v36 = vsub.f32 1.5, %v1195_v35 }
 0xb96   :  { %v1821_v37 = vpop.eup %1820 }
 0xb97   :  { %v1197_v38 = vmul.f32 %v1819_v32, %v1196_v36  ;;  %v1203_v6 = vmul.f32 %v1821_v37, %v1191_v34  ;;  %vm1209_vm14 = vweird.f32 %v1821_v37 }
 0xb98   :  { %vm1210_vm1 = vmor %vm1208_vm15, %vm1209_vm14 }
 0xb99   :  { %v1201_v39 = vsel %vm1200_vm12, %v1819_v32, %v1197_v38  ;;  %v1204_v40 = vmul.f32 %v1821_v37, %v1203_v6  ;;  %v1762_v38 = vld [vmem:[%s2413_s7 + $0x1] ss:$0 sm:$0xff] }
 0xb9a   :  { %v1212_v41 = vmul.f32 %v1201_v39, %v1178_v20 }
 0xb9b   :  { %v1205_v43 = vmul.f32 0.5, %v1204_v40 }
 0xb9c   :  { %v1217_v52 = vmul.f32 %v1757_v29, %v1212_v41 }
 0xb9d   :  { %v1206_v45 = vsub.f32 1.5, %v1205_v43 }
 0xb9e   :  { %v1222_v58 = vadd.f32 %v1758_v42, %v1217_v52 }
 0xb9f   :  { %v1207_v46 = vmul.f32 %v1821_v37, %v1206_v45 }
 0xba0   :  { %v1229_v47 = vadd.f32 %v1759_v44, %v1222_v58 }
 0xba1   :  { %v1211_v48 = vsel %vm1210_vm1, %v1821_v37, %v1207_v46 }
 0xba2   :  { %v1235_v49 = vsel %vm71_vm0, %v1229_v47, 0.0  ;;  %v1213_v50 = vmul.f32 %v1211_v48, %v1179_v18  ;;  %v1760_v18 = vld [vmem:[%s2412_s6 + $0x12] ss:$0 sm:$0xff] }
 0xba3   :  { %1236 = vadd.xlane.f32.xlu0 %v1235_v49 }
 0xba4   :  { %v1218_v51 = vmul.f32 %v1757_v29, %v1213_v50 }
 0xba6   :  { %v1223_v54 = vadd.f32 %v1758_v42, %v1218_v51  ;;  %v1713_v51 = vld [vmem:[%s2411_s5 + $0x68] sm:$0xff] }
 0xba8   :  { %v1230_v55 = vadd.f32 %v1759_v44, %v1223_v54  ;;  %v1715_v44 = vld [vmem:[%s2411_s5 + $0x78] sm:$0xff] }
 0xba9   :  { %1444 = vmatpush.msrb.mxu0 %v1715_v44 }
 0xbaa   :  { %v1238_v56 = vsel %vm71_vm0, %v1230_v55, 0.0 }
 0xbab   :  { %1239 = vadd.xlane.f32.xlu1 %v1238_v56  ;;  %v1712_v56 = vld [vmem:[%s2411_s5 + $0x60] sm:$0xff] }
 0xc16   :  { %v1237_v53 = vpop.xlane.xlu0 %1236 }
 0xc17   :  { %v1241_v57 = vmul.f32 %v1237_v53, %v2064_v31 }
 0xc19   :  { %v1243_v60 = vsub.f32 %v1229_v47, %v1241_v57  ;;  %v1714_v47 = vld [vmem:[%s2411_s5 + $0x70] sm:$0xff] }
 0xc1a   :  { %1445 = vmatpush.msrb.mxu0 %v1714_v47 }
 0xc1b   :  { %v1245_v61 = vmul.f32 %v1243_v60, %v1243_v60 }
 0xc1c   :  { %1446 = vmatpush.msrb.mxu0 %v1713_v51 }
 0xc1d   :  { %v1247_v0 = vsel %vm71_vm0, %v1245_v61, 0.0  ;;  %v1711_v61 = vld [vmem:[%s2411_s5 + $0x58] sm:$0xff] }
 0xc1e   :  { %1248 = vadd.xlane.f32.xlu2 %v1247_v0  ;;  %v1240_v2 = vpop.xlane.xlu1 %1239  ;;  %1447 = vmatpush.msrb.mxu0 %v1712_v56 }
 0xc1f   :  { %v1242_v3 = vmul.f32 %v1240_v2, %v2064_v31 }
 0xc20   :  { %1448 = vmatpush.msrb.mxu0 %v1711_v61 }
 0xc21   :  { %v1244_v4 = vsub.f32 %v1230_v55, %v1242_v3 }
 0xc23   :  { %v1246_v5 = vmul.f32 %v1244_v4, %v1244_v4 }
 0xc25   :  { %v1250_v7 = vsel %vm71_vm0, %v1246_v5, 0.0 }
 0xc26   :  { %1251 = vadd.xlane.f32.xlu0 %v1250_v7 }
 0xc91   :  { %v1249_v11 = vpop.xlane.xlu2 %1248 }
 0xc92   :  { %v1253_v12 = vmul.f32 %v1249_v11, %v2064_v31 }
 0xc94   :  { %v1255_v13 = vadd.f32 1e-05, %v1253_v12 }
 0xc96   :  { %1822 = vrsqrt.f32 %v1255_v13  ;;  %vm1263_vm3 = vweird.f32 %v1255_v13 }
 0xc99   :  { %v1252_v14 = vpop.xlane.xlu0 %1251 }
 0xc9a   :  { %v1254_v15 = vmul.f32 %v1252_v14, %v2064_v31 }
 0xc9c   :  { %v1823_v16 = vpop.eup %1822  ;;  %v1256_v19 = vadd.f32 1e-05, %v1254_v15 }
 0xc9d   :  { %v1258_v17 = vmul.f32 %v1823_v16, %v1255_v13  ;;  %vm1264_vm2 = vweird.f32 %v1823_v16  ;;  %v1708_v13 = vld [vmem:[%s2411_s5 + $0x40] sm:$0xff] }
 0xc9e   :  { %1824 = vrsqrt.f32 %v1256_v19  ;;  %vm1265_vm5 = vmor %vm1263_vm3, %vm1264_vm2  ;;  %vm1273_vm7 = vweird.f32 %v1256_v19 }
 0xc9f   :  { %v1259_v20 = vmul.f32 %v1823_v16, %v1258_v17 }
 0xca1   :  { %v1260_v21 = vmul.f32 0.5, %v1259_v20 }
 0xca3   :  { %v1261_v22 = vsub.f32 1.5, %v1260_v21 }
 0xca4   :  { %v1825_v23 = vpop.eup %1824 }
 0xca5   :  { %v1262_v63 = vmul.f32 %v1823_v16, %v1261_v22  ;;  %v1268_v25 = vmul.f32 %v1825_v23, %v1256_v19  ;;  %vm1274_vm6 = vweird.f32 %v1825_v23 }
 0xca6   :  { %vm1275_vm8 = vmor %vm1273_vm7, %vm1274_vm6 }
 0xca7   :  { %v1266_v24 = vsel %vm1265_vm5, %v1823_v16, %v1262_v63  ;;  %v1269_v26 = vmul.f32 %v1825_v23, %v1268_v25 }
 0xca8   :  { %v1277_v28 = vmul.f32 %v1266_v24, %v1243_v60 }
 0xca9   :  { %v1270_v62 = vmul.f32 0.5, %v1269_v26 }
 0xcaa   :  { %v1282_v30 = vmul.f32 %v1760_v18, %v1277_v28 }
 0xcab   :  { %v1271_v32 = vsub.f32 1.5, %v1270_v62 }
 0xcac   :  { %v2296_v33 = vadd.f32 %v1761_v27, %v1282_v30 }
 0xcad   :  { %v1272_v34 = vmul.f32 %v1825_v23, %v1271_v32 }
 0xcae   :  { %1704 = vmatmul.msk.f32.vlgmr.msrb.gmra.mxu3 %vm71_vm0, %v2296_v33 }
 0xcaf   :  { %v1276_v10 = vsel %vm1275_vm8, %v1825_v23, %v1272_v34 }
 0xcb0   :  { %v1278_v35 = vmul.f32 %v1276_v10, %v1244_v4  ;;  %v1710_v4 = vld [vmem:[%s2411_s5 + $0x50] sm:$0xff] }
 0xcb1   :  { %1449 = vmatpush.msrb.mxu0 %v1710_v4 }
 0xcb2   :  { %v1283_v36 = vmul.f32 %v1760_v18, %v1278_v35 }
 0xcb3   :  { %1450 = vmatpush.msrb.mxu0 %v1709_v1 }
 0xcb4   :  { %v2300_v37 = vadd.f32 %v1761_v27, %v1283_v36 }
 0xcb5   :  { %1451 = vmatpush.msrb.mxu0 %v1708_v13 }
 0xcb6   :  { %1705 = vmatmul.msk.f32.gmra.mxu3 %vm71_vm0, %v2300_v37 }
 0xd31   :  { %v1322_v6 = vpop.f32.mrf.mxu3 }
 0xd32   :  { %v2307_v29 = vadd.f32 %v1762_v38, %v1322_v6 }
 0xd34   :  { %v2310_v39 = vmul.f32 0.70710677, %v2307_v29 }
 0xd36   :  { %v1332_v40 = vmul.f32 %v2310_v39, %v2310_v39 }
 0xd38   :  { %v1333_v41 = vmin.f32 %v1332_v40, 16.0 }
 0xd39   :  { %v1325_v52 = vpop.f32.mrf.mxu3 }
 0xd3a   :  { %v1334_v42 = vmul.f32 2.1237322e-06, %v1333_v41  ;;  %v1345_v43 = vmul.f32 3.8918573e-05, %v1333_v41  ;;  %v2317_v45 = vadd.f32 %v1762_v38, %v1325_v52 }
 0xd3c   :  { %v1335_v58 = vadd.f32 0.00028619796, %v1334_v42  ;;  %v1346_v46 = vadd.f32 0.001143296, %v1345_v43  ;;  %v2323_v48 = vmul.f32 0.70710677, %v2317_v45 }
 0xd3e   :  { %v1336_v49 = vmul.f32 %v1335_v58, %v1333_v41  ;;  %v1347_v50 = vmul.f32 %v1346_v46, %v1333_v41  ;;  %v1372_v54 = vmul.f32 %v2323_v48, %v2323_v48 }
 0xd40   :  { %v1348_v55 = vadd.f32 0.014752088, %v1347_v50  ;;  %v1337_v53 = vadd.f32 0.0036580483, %v1336_v49  ;;  %v1373_v57 = vmin.f32 %v1372_v54, 16.0 }
 0xd42   :  { %v1349_v60 = vmul.f32 %v1348_v55, %v1333_v41  ;;  %v1374_v0 = vmul.f32 2.1237322e-06, %v1373_v57  ;;  %v1385_v2 = vmul.f32 3.8918573e-05, %v1373_v57  ;;  %v1338_v5 = vmul.f32 %v1337_v53, %v1333_v41 }
 0xd43   :  { %v1328_v53 = vmul.f32 0.5, %v2307_v29  ;;  %v1763_v29 = vld [vmem:[%s2412_s6 + $0xf] ss:$0 sm:$0xff] }
 0xd44   :  { %v1350_v3 = vadd.f32 0.112945676, %v1349_v60  ;;  %v1375_v7 = vadd.f32 0.00028619796, %v1374_v0  ;;  %v1386_v59 = vadd.f32 0.001143296, %v1385_v2 }
 0xd45   :  { %v1339_v14 = vadd.f32 0.05243302, %v1338_v5 }
 0xd46   :  { %v1351_v8 = vmul.f32 %v1350_v3, %v1333_v41  ;;  %v1376_v9 = vmul.f32 %v1375_v7, %v1373_v57  ;;  %v1387_v11 = vmul.f32 %v1386_v59, %v1373_v57  ;;  %v1329_v7 = vmul.f32 0.5, %v2317_v45 }
 0xd47   :  { %v1340_v21 = vmul.f32 %v1339_v14, %v1333_v41 }
 0xd48   :  { %v1352_v12 = vadd.f32 0.4994258, %v1351_v8  ;;  %v1388_v15 = vadd.f32 0.014752088, %v1387_v11  ;;  %v1377_v17 = vadd.f32 0.0036580483, %v1376_v9 }
 0xd49   :  { %v1341_v18 = vadd.f32 0.18741608, %v1340_v21 }
 0xd4a   :  { %v1353_v16 = vmul.f32 %v1352_v12, %v1333_v41  ;;  %v1389_v19 = vmul.f32 %v1388_v15, %v1373_v57  ;;  %v1378_v23 = vmul.f32 %v1377_v17, %v1373_v57 }
 0xd4b   :  { %v1342_v27 = vmul.f32 %v1341_v18, %v1333_v41 }
 0xd4c   :  { %v1354_v20 = vadd.f32 1.0, %v1353_v16  ;;  %v1390_v22 = vadd.f32 0.112945676, %v1389_v19  ;;  %v1379_v24 = vadd.f32 0.05243302, %v1378_v23 }
 0xd4d   :  { %v1343_v35 = vadd.f32 1.1283791, %v1342_v27 }
 0xd4e   :  { %1826 = vrcp.f32 %v1354_v20  ;;  %v1391_v63 = vmul.f32 %v1390_v22, %v1373_v57  ;;  %v1380_v32 = vmul.f32 %v1379_v24, %v1373_v57  ;;  %v1366_v10 = vand.u32 2147483648, %v1354_v20 }
 0xd4f   :  { %v1364_v38 = vand.u32 2147483647, %v1354_v20  ;;  %vm1360_vm10 = vweird.f32 %v1354_v20  ;;  %v1344_v52 = vmul.f32 %v1343_v35, %v2310_v39 }
 0xd50   :  { %v1392_v25 = vadd.f32 0.4994258, %v1391_v63  ;;  %v1381_v6 = vadd.f32 0.18741608, %v1380_v32  ;;  %v1367_v42 = vor.u32 1.1754944e-38, %v1366_v10 }
 0xd51   :  { %vm1365_vm11 = vcmp.eq.f32.partialorder %v1364_v38, 8.507059e+37  ;;  %v1764_v38 = vld [vmem:[%s2412_s6 + $0x14] ss:$0 sm:$0xff] }
 0xd52   :  { %v1393_v28 = vmul.f32 %v1392_v25, %v1373_v57  ;;  %v1382_v58 = vmul.f32 %v1381_v6, %v1373_v57 }
 0xd54   :  { %v1827_v26 = vpop.eup %1826  ;;  %v1394_v62 = vadd.f32 1.0, %v1393_v28  ;;  %v1383_v54 = vadd.f32 1.1283791, %v1382_v58 }
 0xd55   :  { %v1356_v30 = vmul.f32 %v1827_v26, %v1354_v20  ;;  %vm1361_vm9 = vweird.f32 %v1827_v26 }
 0xd56   :  { %1828 = vrcp.f32 %v1394_v62  ;;  %vm1362_vm4 = vmor %vm1360_vm10, %vm1361_vm9  ;;  %v1406_v51 = vand.u32 2147483648, %v1394_v62  ;;  %v1404_v56 = vand.u32 2147483647, %v1394_v62  ;;  %vm1400_vm14 = vweird.f32 %v1394_v62 }
 0xd57   :  { %v1357_v34 = vsub.f32 1.0, %v1356_v30  ;;  %v1384_v2 = vmul.f32 %v1383_v54, %v2323_v48 }
 0xd58   :  { %v1407_v39 = vor.u32 1.1754944e-38, %v1406_v51  ;;  %vm1405_vm1 = vcmp.eq.f32.partialorder %v1404_v56, 8.507059e+37 }
 0xd59   :  { %v1358_v36 = vmul.f32 %v1827_v26, %v1357_v34 }
 0xd5b   :  { %v1359_v40 = vadd.f32 %v1827_v26, %v1358_v36 }
 0xd5c   :  { %v1829_v43 = vpop.eup %1828 }
 0xd5d   :  { %v1363_v44 = vsel %vm1362_vm4, %v1827_v26, %v1359_v40  ;;  %v1396_v46 = vmul.f32 %v1829_v43, %v1394_v62  ;;  %vm1401_vm12 = vweird.f32 %v1829_v43 }
 0xd5e   :  { %v1368_v41 = vsel %vm1365_vm11, %v1367_v42, %v1363_v44  ;;  %vm1402_vm15 = vmor %vm1400_vm14, %vm1401_vm12 }
 0xd5f   :  { %v1369_v47 = vmul.f32 %v1368_v41, %v1344_v52  ;;  %v1397_v49 = vsub.f32 1.0, %v1396_v46 }
 0xd61   :  { %v1706_v50 = vclamps-f32 %v1369_v47, 1.0  ;;  %v1398_v55 = vmul.f32 %v1829_v43, %v1397_v49 }
 0xd63   :  { %v1412_v60 = vadd.f32 1.0, %v1706_v50  ;;  %v1399_v61 = vadd.f32 %v1829_v43, %v1398_v55 }
 0xd65   :  { %v1414_v0 = vmul.f32 %v1412_v60, %v1328_v53  ;;  %v1403_v57 = vsel %vm1402_vm15, %v1829_v43, %v1399_v61  ;;  %v1765_v43 = vld [vmem:[%s2412_s6 + $0x15] ss:$0 sm:$0xff] }
 0xd66   :  { %v1408_v3 = vsel %vm1405_vm1, %v1407_v39, %v1403_v57 }
 0xd67   :  { %1717 = vmatmul.msk.f32.vlgmr.msrb.gmra.mxu0 %vm727_vm13, %v1414_v0  ;;  %v1409_v4 = vmul.f32 %v1408_v3, %v1384_v2 }
 0xd69   :  { %v1707_v5 = vclamps-f32 %v1409_v4, 1.0 }
 0xd6b   :  { %v1413_v59 = vadd.f32 1.0, %v1707_v5  ;;  %v1580_v5 = vld [vmem:[%s2414_s8 + $0x18] sm:$0xff] }
 0xd6c   :  { %1599 = vmatpush.msrb.mxu1 %v1580_v5 }
 0xd6d   :  { %v1415_v8 = vmul.f32 %v1413_v59, %v1329_v7  ;;  %v1579_v7 = vld [vmem:[%s2414_s8 + $0x10] sm:$0xff]  ;;  %v1578_v59 = vld [vmem:[%s2414_s8 + $0x8] sm:$0xff] }
 0xd6e   :  { %1600 = vmatpush.msrb.mxu1 %v1579_v7 }
 0xd6f   :  { %1718 = vmatmul.msk.f32.gmra.mxu0 %vm727_vm13, %v1415_v8  ;;  %v1577_v8 = vld [vmem:[%s2414_s8] sm:$0xff] }
 0xd70   :  { %1601 = vmatpush.msrb.mxu1 %v1578_v59 }
 0xd72   :  { %1602 = vmatpush.msrb.mxu1 %v1577_v8 }
 0xde4   :  { %v1453_v1 = vpop.f32.mrf.mxu0 }
 0xde5   :  { %v1454_v9 = vadd.f32 %v1763_v29, %v1453_v1 }
 0xde7   :  { %v1459_v48 = vadd.f32 %v1454_v9, %v2296_v33 }
 0xde9   :  { %v1465_v11 = vsel %vm71_vm0, %v1459_v48, 0.0 }
 0xdea   :  { %1466 = vadd.xlane.f32.xlu1 %v1465_v11 }
 0xdec   :  { %v1456_v12 = vpop.f32.mrf.mxu0 }
 0xded   :  { %v1457_v13 = vadd.f32 %v1763_v29, %v1456_v12 }
 0xdef   :  { %v1460_v14 = vadd.f32 %v1457_v13, %v2300_v37 }
 0xdf1   :  { %v1468_v45 = vsel %vm71_vm0, %v1460_v14, 0.0 }
 0xdf2   :  { %1469 = vadd.xlane.f32.xlu2 %v1468_v45 }
 0xe5d   :  { %v1467_v15 = vpop.xlane.xlu1 %1466 }
 0xe5e   :  { %v1471_v16 = vmul.f32 %v1467_v15, %v2064_v31 }
 0xe60   :  { %v1473_v17 = vsub.f32 %v1459_v48, %v1471_v16 }
 0xe62   :  { %v1475_v19 = vmul.f32 %v1473_v17, %v1473_v17 }
 0xe64   :  { %v1477_v20 = vsel %vm71_vm0, %v1475_v19, 0.0 }
 0xe65   :  { %1478 = vadd.xlane.f32.xlu0 %v1477_v20  ;;  %v1470_v21 = vpop.xlane.xlu2 %1469  ;;  %v1766_v20 = vld [vmem:[%s2412_s6 + $0x16] ss:$0 sm:$0xff] }
 0xe66   :  { %v1472_v33 = vmul.f32 %v1470_v21, %v2064_v31 }
 0xe68   :  { %v1474_v22 = vsub.f32 %v1460_v14, %v1472_v33 }
 0xe6a   :  { %v1476_v23 = vmul.f32 %v1474_v22, %v1474_v22 }
 0xe6c   :  { %v1480_v63 = vsel %vm71_vm0, %v1476_v23, 0.0  ;;  %v1767_v23 = vld [vmem:[%s2412_s6 + $0x17] ss:$0 sm:$0xff]  ;;  %s1897_s6 = smov [#allocation5]  }
 0xe6d   :  { %1481 = vadd.xlane.f32.xlu1 %v1480_v63  ;;  %s1616_s3 = sshll.u32 %s1897_s6, 4  ;;  %s1617_s3 = int_to_ptr.vmem [resolvable:$true] %s1616_s3 }
 0xed8   :  { %v1479_v37 = vpop.xlane.xlu0 %1478 }
 0xed9   :  { %v1483_v18 = vmul.f32 %v1479_v37, %v2064_v31 }
 0xedb   :  { %v1485_v25 = vadd.f32 1e-05, %v1483_v18 }
 0xedd   :  { %1830 = vrsqrt.f32 %v1485_v25  ;;  %vm1493_vm2 = vweird.f32 %v1485_v25 }
 0xee0   :  { %v1482_v24 = vpop.xlane.xlu1 %1481 }
 0xee1   :  { %v1484_v28 = vmul.f32 %v1482_v24, %v2064_v31 }
 0xee3   :  { %v1831_v26 = vpop.eup %1830  ;;  %v1486_v30 = vadd.f32 1e-05, %v1484_v28 }
 0xee4   :  { %v1488_v27 = vmul.f32 %v1831_v26, %v1485_v25  ;;  %vm1494_vm13 = vweird.f32 %v1831_v26 }
 0xee5   :  { %1832 = vrsqrt.f32 %v1486_v30  ;;  %vm1495_vm3 = vmor %vm1493_vm2, %vm1494_vm13  ;;  %vm1503_vm6 = vweird.f32 %v1486_v30 }
 0xee6   :  { %v1489_v62 = vmul.f32 %v1831_v26, %v1488_v27 }
 0xee8   :  { %v1490_v32 = vmul.f32 0.5, %v1489_v62 }
 0xeea   :  { %v1491_v34 = vsub.f32 1.5, %v1490_v32 }
 0xeeb   :  { %v1833_v10 = vpop.eup %1832 }
 0xeec   :  { %v1492_v35 = vmul.f32 %v1831_v26, %v1491_v34  ;;  %v1498_v36 = vmul.f32 %v1833_v10, %v1486_v30  ;;  %vm1504_vm5 = vweird.f32 %v1833_v10 }
 0xeed   :  { %vm1505_vm7 = vmor %vm1503_vm6, %vm1504_vm5 }
 0xeee   :  { %v1496_v6 = vsel %vm1495_vm3, %v1831_v26, %v1492_v35  ;;  %v1499_v40 = vmul.f32 %v1833_v10, %v1498_v36 }
 0xeef   :  { %v1507_v42 = vmul.f32 %v1496_v6, %v1473_v17 }
 0xef0   :  { %v1500_v52 = vmul.f32 0.5, %v1499_v40 }
 0xef1   :  { %v1512_v44 = vmul.f32 %v1764_v38, %v1507_v42 }
 0xef2   :  { %v1501_v41 = vsub.f32 1.5, %v1500_v52 }
 0xef3   :  { %v1517_v58 = vadd.f32 %v1765_v43, %v1512_v44 }
 0xef4   :  { %v1502_v46 = vmul.f32 %v1833_v10, %v1501_v41 }
 0xef5   :  { %v1523_v47 = vsel %vm71_vm0, %v1517_v58, 0.0 }
 0xef6   :  { %1524 = vadd.xlane.f32.xlu2 %v1523_v47  ;;  %v1506_v49 = vsel %vm1505_vm7, %v1833_v10, %v1502_v46 }
 0xef7   :  { %v1508_v50 = vmul.f32 %v1506_v49, %v1474_v22 }
 0xef9   :  { %v1513_v51 = vmul.f32 %v1764_v38, %v1508_v50 }
 0xefb   :  { %v1518_v54 = vadd.f32 %v1765_v43, %v1513_v51 }
 0xefd   :  { %v1526_v55 = vsel %vm71_vm0, %v1518_v54, 0.0 }
 0xefe   :  { %1527 = vadd.xlane.f32.xlu0 %v1526_v55 }
 0xf69   :  { %v1525_v56 = vpop.xlane.xlu2 %1524 }
 0xf6a   :  { %v1529_v53 = vmul.f32 %v1525_v56, %v2064_v31 }
 0xf6c   :  { %v1531_v60 = vsub.f32 %v1517_v58, %v1529_v53 }
 0xf6e   :  { %v1533_v61 = vmul.f32 %v1531_v60, %v1531_v60 }
 0xf70   :  { %v1535_v0 = vsel %vm71_vm0, %v1533_v61, 0.0 }
 0xf71   :  { %1536 = vadd.xlane.f32.xlu1 %v1535_v0  ;;  %v1528_v39 = vpop.xlane.xlu0 %1527 }
 0xf72   :  { %v1530_v2 = vmul.f32 %v1528_v39, %v2064_v31 }
 0xf74   :  { %v1532_v57 = vsub.f32 %v1518_v54, %v1530_v2 }
 0xf76   :  { %v1534_v3 = vmul.f32 %v1532_v57, %v1532_v57 }
 0xf78   :  { %v1538_v4 = vsel %vm71_vm0, %v1534_v3, 0.0 }
 0xf79   :  { %1539 = vadd.xlane.f32.xlu2 %v1538_v4 }
 0xfe4   :  { %v1537_v29 = vpop.xlane.xlu1 %1536 }
 0xfe5   :  { %v1541_v1 = vmul.f32 %v1537_v29, %v2064_v31 }
 0xfe7   :  { %v1543_v9 = vadd.f32 1e-05, %v1541_v1 }
 0xfe9   :  { %1834 = vrsqrt.f32 %v1543_v9  ;;  %vm1551_vm9 = vweird.f32 %v1543_v9 }
 0xfec   :  { %v1540_v48 = vpop.xlane.xlu2 %1539 }
 0xfed   :  { %v1542_v11 = vmul.f32 %v1540_v48, %v2064_v31 }
 0xfef   :  { %v1835_v12 = vpop.eup %1834  ;;  %v1544_v14 = vadd.f32 1e-05, %v1542_v11 }
 0xff0   :  { %v1546_v13 = vmul.f32 %v1835_v12, %v1543_v9  ;;  %vm1552_vm8 = vweird.f32 %v1835_v12 }
 0xff1   :  { %1836 = vrsqrt.f32 %v1544_v14  ;;  %vm1553_vm10 = vmor %vm1551_vm9, %vm1552_vm8  ;;  %vm1561_vm11 = vweird.f32 %v1544_v14 }
 0xff2   :  { %v1547_v45 = vmul.f32 %v1835_v12, %v1546_v13 }
 0xff4   :  { %v1548_v15 = vmul.f32 0.5, %v1547_v45 }
 0xff6   :  { %v1549_v16 = vsub.f32 1.5, %v1548_v15 }
 0xff7   :  { %v1837_v17 = vpop.eup %1836 }
 0xff8   :  { %v1550_v19 = vmul.f32 %v1835_v12, %v1549_v16  ;;  %v1556_v21 = vmul.f32 %v1837_v17, %v1544_v14  ;;  %vm1562_vm4 = vweird.f32 %v1837_v17 }
 0xff9   :  { %vm1563_vm12 = vmor %vm1561_vm11, %vm1562_vm4 }
 0xffa   :  { %v1554_v33 = vsel %vm1553_vm10, %v1835_v12, %v1550_v19  ;;  %v1557_v31 = vmul.f32 %v1837_v17, %v1556_v21 }
 0xffb   :  { %v1565_v22 = vmul.f32 %v1554_v33, %v1531_v60 }
 0xffc   :  { %v1558_v37 = vmul.f32 0.5, %v1557_v31 }
 0xffd   :  { %v1570_v63 = vmul.f32 %v1766_v20, %v1565_v22 }
 0xffe   :  { %v1559_v18 = vsub.f32 1.5, %v1558_v37 }
 0xfff   :  { %v1575_v25 = vadd.f32 %v1767_v23, %v1570_v63 }
0x1000   :  { %v1560_v24 = vmul.f32 %v1837_v17, %v1559_v18 }
0x1001   :  { %1723 = vmatmul.msk.f32.vlgmr.msrb.gmra.mxu1 %vm71_vm0, %v1575_v25 }
0x1002   :  { %v1564_v28 = vsel %vm1563_vm12, %v1837_v17, %v1560_v24 }
0x1003   :  { %v1566_v26 = vmul.f32 %v1564_v28, %v1532_v57 }
0x1005   :  { %v1571_v27 = vmul.f32 %v1766_v20, %v1566_v26 }
0x1007   :  { %v1576_v30 = vadd.f32 %v1767_v23, %v1571_v27 }
0x1009   :  { %1724 = vmatmul.msk.f32.gmra.mxu1 %vm71_vm0, %v1576_v30 }
0x107e   :  { %v1604_v62 = vpop.f32.mrf.mxu1 }
0x107f   :  { %1610 = vst.msk [vmem:[#allocation5] sm:$0xff] %vm71_vm0, %v1604_v62 }
0x1086   :  { %v1607_v32 = vpop.f32.mrf.mxu1 }
0x1087   :  { %1611 = vst.msk [vmem:[#allocation5 + $0x8] sm:$0xff] %vm71_vm0, %v1607_v32 }
0x1088   :  { %1624 = dma.vmem_to_hbm [thread:$0]  %s1617_s3, 256, %s1619_s21, [#allocation4], %s1891_s14, %s1891_s14, %s1892_s15  }
0x1089   :  { %1888 = dma.done.wait [#allocation4], 256  }
0x108a   :  { %1889 = vsyncadd [#allocation4], 4294967040 }
0x108b   :  { %1629 = vsyncpa [#allocation3], 1 }
0x108c   :  { %1630 = vsyncpa [#allocation4], 1 }

</bundles_post_ra>
